<compile_context>
chip_gen: v5e
topology: v5e:2x2
jax: 0.10.0
libtpu: 0.0.40
codegen_flags: <defaults>
</compile_context>

<pallas_src>
import jax
import jax.numpy as jnp
from jax import lax
from jax.experimental import pallas as pl
from jax.experimental.pallas import tpu as pltpu

K = 3             # kernel size
STRIDE = 2
PAD = 1
OUT_PAD = 1
NEG_SLOPE = 0.01  # nn.LeakyReLU default negative_slope


def _upsample_kernel(x00_ref, x01_ref, x10_ref, x11_ref,
                     wp_ref, wq_ref, wr_ref, ws_ref, b_ref, o_ref):
    """One (batch, row-tile) step of ConvTranspose2d(3,2,1,1) + bias + LeakyReLU.

    x??_ref: (1, TH, W, Cin)  bf16 shifted input views (x[r+dh, c+dw], zero-padded)
    wp_ref:  (Cin, 4*Cout)    taps feeding x[r, c]      (phases (0,0),(0,1),(1,0),(1,1))
    wq_ref:  (Cin, 2*Cout)    taps feeding x[r, c+1]    (phases (0,1),(1,1))
    wr_ref:  (Cin, 2*Cout)    taps feeding x[r+1, c]    (phases (1,0),(1,1))
    ws_ref:  (Cin,   Cout)    tap  feeding x[r+1, c+1]  (phase  (1,1))
    b_ref:   (1, Cout)        f32 bias
    o_ref:   (TH, 2, W, 2*Cout)  2*TH output rows; flattens to NHWC (2*TH, 2*W, Cout)
    """
    th, _, w, cout2 = o_ref.shape
    cout = cout2 // 2
    cin = x00_ref.shape[3]
    m = th * w

    # (TH, W, Cin) -> (TH*W, Cin): pure view when W % 8 == 0 (lane dim untouched).
    x00 = x00_ref[0].reshape(m, cin)
    x01 = x01_ref[0].reshape(m, cin)
    x10 = x10_ref[0].reshape(m, cin)
    x11 = x11_ref[0].reshape(m, cin)

    # 4 MXU matmuls over exactly the 9 real taps; f32 accumulation inside the MXU.
    r1 = jnp.dot(x00, wp_ref[...], preferred_element_type=jnp.float32)  # (m, 4*Cout)
    r2 = jnp.dot(x01, wq_ref[...], preferred_element_type=jnp.float32)  # (m, 2*Cout)
    r3 = jnp.dot(x10, wr_ref[...], preferred_element_type=jnp.float32)  # (m, 2*Cout)
    r4 = jnp.dot(x11, ws_ref[...], preferred_element_type=jnp.float32)  # (m,   Cout)

    y00 = r1[:, 0 * cout:1 * cout]
    y01 = r1[:, 1 * cout:2 * cout] + r2[:, :cout]
    y10 = r1[:, 2 * cout:3 * cout] + r3[:, :cout]
    y11 = r1[:, 3 * cout:4 * cout] + r2[:, cout:] + r3[:, cout:] + r4

    bias = b_ref[...]                               # (1, Cout), broadcasts over rows

    def finalize(v):
        v = v + bias
        v = jnp.where(v > 0, v, NEG_SLOPE * v)      # LeakyReLU
        return v.reshape(th, w, cout).astype(o_ref.dtype)

    o_ref[:, 0, :, :cout] = finalize(y00)           # even rows, even cols
    o_ref[:, 0, :, cout:] = finalize(y01)           # even rows, odd  cols
    o_ref[:, 1, :, :cout] = finalize(y10)           # odd  rows, even cols
    o_ref[:, 1, :, cout:] = finalize(y11)           # odd  rows, odd  cols


def _pack_params(weight, bias):
    """weight (Cin, Cout, K, K) [PyTorch ConvTranspose2d layout] -> 4 bf16 tap matrices.

    Output pixel (2r+ph, 2c+pw) receives x[r+dh, c+dw] through tap
    (kh, kw) = (ph + 1 - 2*dh, pw + 1 - 2*dw) whenever 0 <= kh, kw < 3, i.e. exactly the
    9 real taps of the 3x3 kernel split over the 4 input shifts (dh, dw).
    """
    cout = weight.shape[1]
    tap = lambda kh, kw: weight[:, :, kh, kw]                               # (Cin, Cout)
    w_p = jnp.concatenate([tap(1, 1), tap(1, 2), tap(2, 1), tap(2, 2)], axis=1)  # x[r,   c  ]
    w_q = jnp.concatenate([tap(1, 0), tap(2, 0)], axis=1)                        # x[r,   c+1]
    w_r = jnp.concatenate([tap(0, 1), tap(0, 2)], axis=1)                        # x[r+1, c  ]
    w_s = tap(0, 0)                                                              # x[r+1, c+1]
    bf = lambda a: a.astype(jnp.bfloat16)
    return (bf(w_p), bf(w_q), bf(w_r), bf(w_s),
            bias.astype(jnp.float32).reshape(1, cout))


def _pick_row_tile(h, w, cin, cout, budget_bytes=40 * 1024 * 1024):
    """Largest row tile TH | H whose per-step working set fits a conservative VMEM budget
    (sized against v7x's 64 MiB per-TC VMEM; v5e/v6e (128 MiB) just get the max tile)."""
    weight_bytes = 2 * 9 * cin * cout * 2              # bf16 taps, double-buffered
    for th in (32, 16, 8, 4, 2, 1):
        if h % th:
            continue
        in_bytes = 2 * 4 * th * w * cin * 2            # 4 shifted inputs, bf16, double-buffered
        out_bytes = 2 * th * 2 * w * 2 * cout * 4      # f32 output tile, double-buffered
        acc_bytes = th * w * 9 * cout * 4              # f32 matmul results
        if weight_bytes + in_bytes + out_bytes + acc_bytes <= budget_bytes:
            return th
    return 1


def conv_transpose_leaky(x, weight, bias):
    """x: (N, Cin, H, W); weight: (Cin, Cout, 3, 3); bias: (Cout,).
    Returns LeakyReLU(conv_transpose(x)) with shape (N, Cout, 2H, 2W)."""
    n, cin, h, w = x.shape
    cout = weight.shape[1]
    oh, ow = STRIDE * h, STRIDE * w
    th = _pick_row_tile(h, w, cin, cout)
    n_row_tiles = h // th

    # channels-last, bf16 MXU inputs (single-pass matmuls, half the DMA bytes).
    x00 = jnp.transpose(x, (0, 2, 3, 1)).astype(jnp.bfloat16)          # x[r,   c  ]
    # Pre-shifted zero-padded views so the kernel needs no slice/concat copies.
    x01 = jnp.pad(x00[:, :, 1:, :], ((0, 0), (0, 0), (0, 1), (0, 0)))  # x[r,   c+1]
    x10 = jnp.pad(x00[:, 1:, :, :], ((0, 0), (0, 1), (0, 0), (0, 0)))  # x[r+1, c  ]
    x11 = jnp.pad(x00[:, 1:, 1:, :], ((0, 0), (0, 1), (0, 1), (0, 0))) # x[r+1, c+1]

    w_p, w_q, w_r, w_s, b_packed = _pack_params(weight, bias)

    x_spec = pl.BlockSpec((1, th, w, cin), lambda b, t: (b, t, 0, 0))
    const_spec = lambda shape: pl.BlockSpec(shape, lambda b, t: (0, 0))

    # Output laid out as (N*H, 2, W, 2*Cout); flattened this is exactly NHWC
    # (N, 2H, 2W, Cout), so kernel-side stores are plain lane-dense tile writes.
    out = pl.pallas_call(
        _upsample_kernel,
        out_shape=jax.ShapeDtypeStruct((n * h, 2, w, 2 * cout), x.dtype),
        grid_spec=pltpu.PrefetchScalarGridSpec(
            num_scalar_prefetch=0,
            grid=(n, n_row_tiles),
            in_specs=[
                x_spec, x_spec, x_spec, x_spec,
                const_spec((cin, 4 * cout)),
                const_spec((cin, 2 * cout)),
                const_spec((cin, 2 * cout)),
                const_spec((cin, cout)),
                const_spec((1, cout)),
            ],
            out_specs=pl.BlockSpec(
                (th, 2, w, 2 * cout),
                lambda b, t: (b * n_row_tiles + t, 0, 0, 0)),
        ),
        compiler_params=pltpu.CompilerParams(
            dimension_semantics=("parallel", "parallel"),
            vmem_limit_bytes=64 * 1024 * 1024),
    )(x00, x01, x10, x11, w_p, w_q, w_r, w_s, b_packed)

    up_nhwc = out.reshape(n, oh, ow, cout)           # pure metadata reshape
    # TODO(synk): NHWC->NCHW transpose kept only to match the PyTorch interface.
    return jnp.transpose(up_nhwc, (0, 3, 1, 2))


def upsample_forward(input_, concat, weight, bias):
    """UpSample.forward: torch.cat((concat, layer(input_)), dim=1)."""
    up = conv_transpose_leaky(input_, weight, bias)
    # TODO(synk): channel concat stays in XLA; writing the up-sampled half straight into a
    # pre-allocated concat buffer (input_output_aliases) would remove this extra copy.
    return jnp.concatenate([concat, up], axis=1)


def _reference(input_, concat, weight, bias):
    """Independent pure-JAX reference (conv_transpose via lhs-dilated conv)."""
    w_oihw = jnp.transpose(jnp.flip(weight, axis=(2, 3)), (1, 0, 2, 3))
    y = lax.conv_general_dilated(
        input_, w_oihw, window_strides=(1, 1),
        padding=((K - 1 - PAD, K - 1 - PAD + OUT_PAD),) * 2,
        lhs_dilation=(STRIDE, STRIDE),
        dimension_numbers=("NCHW", "OIHW", "NCHW"))
    y = y + bias[None, :, None, None]
    y = jnp.where(y > 0, y, NEG_SLOPE * y)
    return jnp.concatenate([concat, y], axis=1)


if __name__ == "__main__":
    key = jax.random.PRNGKey(0)
    k1, k2, k3, k4 = jax.random.split(key, 4)

    N, IN_CH, H, W = 2, 4, 16, 16
    OUT_CH = IN_CH // 2

    def bf16_exact(a):
        # Round test data to bf16-representable f32 so the bf16-input / f32-accumulate
        # kernel matches the f32 reference to accumulation rounding only.
        return a.astype(jnp.bfloat16).astype(jnp.float32)

    input_ = bf16_exact(jax.random.normal(k1, (N, IN_CH, H, W), jnp.float32))
    concat = jax.random.normal(k2, (N, OUT_CH, 2 * H, 2 * W), jnp.float32)

    # deterministic parameter init (PyTorch-style uniform bound); weight layout matches
    # nn.ConvTranspose2d: (in_channels, out_channels, kH, kW).
    bound = 1.0 / (IN_CH * K * K) ** 0.5
    weight = bf16_exact(
        jax.random.uniform(k3, (IN_CH, OUT_CH, K, K), jnp.float32, -bound, bound))
    bias = jax.random.uniform(k4, (OUT_CH,), jnp.float32, -bound, bound)

    fwd = jax.jit(upsample_forward)
    out = jax.block_until_ready(fwd(input_, concat, weight, bias))
    ref = jax.block_until_ready(_reference(input_, concat, weight, bias))

    assert out.shape == (N, OUT_CH + IN_CH // 2, 2 * H, 2 * W), out.shape
    assert jnp.allclose(out, ref, atol=1e-5, rtol=1e-5), \
        float(jnp.max(jnp.abs(out - ref)))
    print("KERNEL_OK")
</pallas_src>

<mosaic_0001>
module attributes {stable_mosaic.version = 11 : i64} {
  func.func @_upsample_kernel(%arg0: i32, %arg1: i32, %arg2: memref<1x16x16x4xbf16, #tpu.memory_space<vmem>>, %arg3: memref<1x16x16x4xbf16, #tpu.memory_space<vmem>>, %arg4: memref<1x16x16x4xbf16, #tpu.memory_space<vmem>>, %arg5: memref<1x16x16x4xbf16, #tpu.memory_space<vmem>>, %arg6: memref<4x8xbf16, #tpu.memory_space<vmem>>, %arg7: memref<4x4xbf16, #tpu.memory_space<vmem>>, %arg8: memref<4x4xbf16, #tpu.memory_space<vmem>>, %arg9: memref<4x2xbf16, #tpu.memory_space<vmem>>, %arg10: memref<1x2xf32, #tpu.memory_space<vmem>>, %arg11: memref<16x2x16x4xf32, #tpu.memory_space<vmem>>) attributes {dimension_semantics = [#tpu.dimension_semantics<parallel>, #tpu.dimension_semantics<parallel>], iteration_bounds = array<i64: 2, 1>, scalar_prefetch = 0 : i64, scratch_operands = 0 : i64, tpu.core_type = #tpu.core_type<tc>, window_params = [{transform_indices = @transform_0, window_bounds = array<i64: 1, 16, 16, 4>}, {transform_indices = @transform_1, window_bounds = array<i64: 1, 16, 16, 4>}, {transform_indices = @transform_2, window_bounds = array<i64: 1, 16, 16, 4>}, {transform_indices = @transform_3, window_bounds = array<i64: 1, 16, 16, 4>}, {pipeline_mode = #tpu.pipeline_mode<synchronous>, transform_indices = @transform_4, window_bounds = array<i64: 4, 8>}, {pipeline_mode = #tpu.pipeline_mode<synchronous>, transform_indices = @transform_5, window_bounds = array<i64: 4, 4>}, {pipeline_mode = #tpu.pipeline_mode<synchronous>, transform_indices = @transform_6, window_bounds = array<i64: 4, 4>}, {pipeline_mode = #tpu.pipeline_mode<synchronous>, transform_indices = @transform_7, window_bounds = array<i64: 4, 2>}, {pipeline_mode = #tpu.pipeline_mode<synchronous>, transform_indices = @transform_8, window_bounds = array<i64: 1, 2>}, {transform_indices = @transform_9, window_bounds = array<i64: 16, 2, 16, 4>}]} {
    %c0 = arith.constant 0 : index
    %c0_0 = arith.constant 0 : index
    %c0_1 = arith.constant 0 : index
    %c0_2 = arith.constant 0 : index
    %0 = vector.load %arg2[%c0, %c0_0, %c0_1, %c0_2] : memref<1x16x16x4xbf16, #tpu.memory_space<vmem>>, vector<1x16x16x4xbf16>
    %1 = vector.shape_cast %0 : vector<1x16x16x4xbf16> to vector<16x16x4xbf16>
    %2 = vector.shape_cast %1 : vector<16x16x4xbf16> to vector<256x4xbf16>
    %c0_3 = arith.constant 0 : index
    %c0_4 = arith.constant 0 : index
    %c0_5 = arith.constant 0 : index
    %c0_6 = arith.constant 0 : index
    %3 = vector.load %arg3[%c0_3, %c0_4, %c0_5, %c0_6] : memref<1x16x16x4xbf16, #tpu.memory_space<vmem>>, vector<1x16x16x4xbf16>
    %4 = vector.shape_cast %3 : vector<1x16x16x4xbf16> to vector<16x16x4xbf16>
    %5 = vector.shape_cast %4 : vector<16x16x4xbf16> to vector<256x4xbf16>
    %c0_7 = arith.constant 0 : index
    %c0_8 = arith.constant 0 : index
    %c0_9 = arith.constant 0 : index
    %c0_10 = arith.constant 0 : index
    %6 = vector.load %arg4[%c0_7, %c0_8, %c0_9, %c0_10] : memref<1x16x16x4xbf16, #tpu.memory_space<vmem>>, vector<1x16x16x4xbf16>
    %7 = vector.shape_cast %6 : vector<1x16x16x4xbf16> to vector<16x16x4xbf16>
    %8 = vector.shape_cast %7 : vector<16x16x4xbf16> to vector<256x4xbf16>
    %c0_11 = arith.constant 0 : index
    %c0_12 = arith.constant 0 : index
    %c0_13 = arith.constant 0 : index
    %c0_14 = arith.constant 0 : index
    %9 = vector.load %arg5[%c0_11, %c0_12, %c0_13, %c0_14] : memref<1x16x16x4xbf16, #tpu.memory_space<vmem>>, vector<1x16x16x4xbf16>
    %10 = vector.shape_cast %9 : vector<1x16x16x4xbf16> to vector<16x16x4xbf16>
    %11 = vector.shape_cast %10 : vector<16x16x4xbf16> to vector<256x4xbf16>
    %c0_15 = arith.constant 0 : index
    %c0_16 = arith.constant 0 : index
    %12 = vector.load %arg6[%c0_15, %c0_16] : memref<4x8xbf16, #tpu.memory_space<vmem>>, vector<4x8xbf16>
    %cst = arith.constant dense<0.000000e+00> : vector<256x8xf32>
    %13 = tpu.matmul %2, %12, %cst {dimension_numbers = #tpu.dot_dimension_numbers<[1], [0], [0], [1], [0, 0, 1, 1], [], []>} : vector<256x4xbf16>, vector<4x8xbf16>, vector<256x8xf32> -> vector<256x8xf32>
    %c0_17 = arith.constant 0 : index
    %c0_18 = arith.constant 0 : index
    %14 = vector.load %arg7[%c0_17, %c0_18] : memref<4x4xbf16, #tpu.memory_space<vmem>>, vector<4x4xbf16>
    %cst_19 = arith.constant dense<0.000000e+00> : vector<256x4xf32>
    %15 = tpu.matmul %5, %14, %cst_19 {dimension_numbers = #tpu.dot_dimension_numbers<[1], [0], [0], [1], [0, 0, 1, 1], [], []>} : vector<256x4xbf16>, vector<4x4xbf16>, vector<256x4xf32> -> vector<256x4xf32>
    %c0_20 = arith.constant 0 : index
    %c0_21 = arith.constant 0 : index
    %16 = vector.load %arg8[%c0_20, %c0_21] : memref<4x4xbf16, #tpu.memory_space<vmem>>, vector<4x4xbf16>
    %cst_22 = arith.constant dense<0.000000e+00> : vector<256x4xf32>
    %17 = tpu.matmul %8, %16, %cst_22 {dimension_numbers = #tpu.dot_dimension_numbers<[1], [0], [0], [1], [0, 0, 1, 1], [], []>} : vector<256x4xbf16>, vector<4x4xbf16>, vector<256x4xf32> -> vector<256x4xf32>
    %c0_23 = arith.constant 0 : index
    %c0_24 = arith.constant 0 : index
    %18 = vector.load %arg9[%c0_23, %c0_24] : memref<4x2xbf16, #tpu.memory_space<vmem>>, vector<4x2xbf16>
    %cst_25 = arith.constant dense<0.000000e+00> : vector<256x2xf32>
    %19 = tpu.matmul %11, %18, %cst_25 {dimension_numbers = #tpu.dot_dimension_numbers<[1], [0], [0], [1], [0, 0, 1, 1], [], []>} : vector<256x4xbf16>, vector<4x2xbf16>, vector<256x2xf32> -> vector<256x2xf32>
    %20 = vector.extract_strided_slice %13 {offsets = [0, 0], sizes = [256, 2], strides = [1, 1]} : vector<256x8xf32> to vector<256x2xf32>
    %21 = vector.extract_strided_slice %13 {offsets = [0, 2], sizes = [256, 2], strides = [1, 1]} : vector<256x8xf32> to vector<256x2xf32>
    %22 = vector.extract_strided_slice %15 {offsets = [0, 0], sizes = [256, 2], strides = [1, 1]} : vector<256x4xf32> to vector<256x2xf32>
    %23 = arith.addf %21, %22 : vector<256x2xf32>
    %24 = vector.extract_strided_slice %13 {offsets = [0, 4], sizes = [256, 2], strides = [1, 1]} : vector<256x8xf32> to vector<256x2xf32>
    %25 = vector.extract_strided_slice %17 {offsets = [0, 0], sizes = [256, 2], strides = [1, 1]} : vector<256x4xf32> to vector<256x2xf32>
    %26 = arith.addf %24, %25 : vector<256x2xf32>
    %27 = vector.extract_strided_slice %13 {offsets = [0, 6], sizes = [256, 2], strides = [1, 1]} : vector<256x8xf32> to vector<256x2xf32>
    %28 = vector.extract_strided_slice %15 {offsets = [0, 2], sizes = [256, 2], strides = [1, 1]} : vector<256x4xf32> to vector<256x2xf32>
    %29 = arith.addf %27, %28 : vector<256x2xf32>
    %30 = vector.extract_strided_slice %17 {offsets = [0, 2], sizes = [256, 2], strides = [1, 1]} : vector<256x4xf32> to vector<256x2xf32>
    %31 = arith.addf %29, %30 : vector<256x2xf32>
    %32 = arith.addf %31, %19 : vector<256x2xf32>
    %c0_26 = arith.constant 0 : index
    %c0_27 = arith.constant 0 : index
    %33 = vector.load %arg10[%c0_26, %c0_27] : memref<1x2xf32, #tpu.memory_space<vmem>>, vector<1x2xf32>
    %34 = vector.broadcast %33 : vector<1x2xf32> to vector<256x2xf32>
    %35 = arith.addf %20, %34 : vector<256x2xf32>
    %cst_28 = arith.constant 0.000000e+00 : f32
    %36 = vector.broadcast %cst_28 : f32 to vector<256x2xf32>
    %37 = arith.cmpf ogt, %35, %36 : vector<256x2xf32>
    %cst_29 = arith.constant 0.00999999977 : f32
    %38 = vector.broadcast %cst_29 : f32 to vector<256x2xf32>
    %39 = arith.mulf %38, %35 : vector<256x2xf32>
    %40 = arith.select %37, %35, %39 : vector<256x2xi1>, vector<256x2xf32>
    %41 = vector.shape_cast %40 : vector<256x2xf32> to vector<16x16x2xf32>
    %c0_30 = arith.constant 0 : index
    %c0_31 = arith.constant 0 : index
    %c0_32 = arith.constant 0 : index
    %c0_33 = arith.constant 0 : index
    %42 = vector.load %arg11[%c0_30, %c0_31, %c0_32, %c0_33] : memref<16x2x16x4xf32, #tpu.memory_space<vmem>>, vector<16x1x16x2xf32>
    %43 = vector.shape_cast %42 : vector<16x1x16x2xf32> to vector<16x16x2xf32>
    %44 = vector.shape_cast %41 : vector<16x16x2xf32> to vector<16x1x16x2xf32>
    tpu.vector_store %arg11[%c0_30, %c0_31, %c0_32, %c0_33], %44 {strides = array<i32>} : memref<16x2x16x4xf32, #tpu.memory_space<vmem>>, vector<16x1x16x2xf32>,
    %45 = vector.broadcast %33 : vector<1x2xf32> to vector<256x2xf32>
    %46 = arith.addf %23, %45 : vector<256x2xf32>
    %cst_34 = arith.constant 0.000000e+00 : f32
    %47 = vector.broadcast %cst_34 : f32 to vector<256x2xf32>
    %48 = arith.cmpf ogt, %46, %47 : vector<256x2xf32>
    %cst_35 = arith.constant 0.00999999977 : f32
    %49 = vector.broadcast %cst_35 : f32 to vector<256x2xf32>
    %50 = arith.mulf %49, %46 : vector<256x2xf32>
    %51 = arith.select %48, %46, %50 : vector<256x2xi1>, vector<256x2xf32>
    %52 = vector.shape_cast %51 : vector<256x2xf32> to vector<16x16x2xf32>
    %c0_36 = arith.constant 0 : index
    %c0_37 = arith.constant 0 : index
    %c0_38 = arith.constant 0 : index
    %c2 = arith.constant 2 : index
    %53 = vector.load %arg11[%c0_36, %c0_37, %c0_38, %c2] : memref<16x2x16x4xf32, #tpu.memory_space<vmem>>, vector<16x1x16x2xf32>
    %54 = vector.shape_cast %53 : vector<16x1x16x2xf32> to vector<16x16x2xf32>
    %55 = vector.shape_cast %52 : vector<16x16x2xf32> to vector<16x1x16x2xf32>
    tpu.vector_store %arg11[%c0_36, %c0_37, %c0_38, %c2], %55 {strides = array<i32>} : memref<16x2x16x4xf32, #tpu.memory_space<vmem>>, vector<16x1x16x2xf32>,
    %56 = vector.broadcast %33 : vector<1x2xf32> to vector<256x2xf32>
    %57 = arith.addf %26, %56 : vector<256x2xf32>
    %cst_39 = arith.constant 0.000000e+00 : f32
    %58 = vector.broadcast %cst_39 : f32 to vector<256x2xf32>
    %59 = arith.cmpf ogt, %57, %58 : vector<256x2xf32>
    %cst_40 = arith.constant 0.00999999977 : f32
    %60 = vector.broadcast %cst_40 : f32 to vector<256x2xf32>
    %61 = arith.mulf %60, %57 : vector<256x2xf32>
    %62 = arith.select %59, %57, %61 : vector<256x2xi1>, vector<256x2xf32>
    %63 = vector.shape_cast %62 : vector<256x2xf32> to vector<16x16x2xf32>
    %c0_41 = arith.constant 0 : index
    %c1 = arith.constant 1 : index
    %c0_42 = arith.constant 0 : index
    %c0_43 = arith.constant 0 : index
    %64 = vector.load %arg11[%c0_41, %c1, %c0_42, %c0_43] : memref<16x2x16x4xf32, #tpu.memory_space<vmem>>, vector<16x1x16x2xf32>
    %65 = vector.shape_cast %64 : vector<16x1x16x2xf32> to vector<16x16x2xf32>
    %66 = vector.shape_cast %63 : vector<16x16x2xf32> to vector<16x1x16x2xf32>
    tpu.vector_store %arg11[%c0_41, %c1, %c0_42, %c0_43], %66 {strides = array<i32>} : memref<16x2x16x4xf32, #tpu.memory_space<vmem>>, vector<16x1x16x2xf32>,
    %67 = vector.broadcast %33 : vector<1x2xf32> to vector<256x2xf32>
    %68 = arith.addf %32, %67 : vector<256x2xf32>
    %cst_44 = arith.constant 0.000000e+00 : f32
    %69 = vector.broadcast %cst_44 : f32 to vector<256x2xf32>
    %70 = arith.cmpf ogt, %68, %69 : vector<256x2xf32>
    %cst_45 = arith.constant 0.00999999977 : f32
    %71 = vector.broadcast %cst_45 : f32 to vector<256x2xf32>
    %72 = arith.mulf %71, %68 : vector<256x2xf32>
    %73 = arith.select %70, %68, %72 : vector<256x2xi1>, vector<256x2xf32>
    %74 = vector.shape_cast %73 : vector<256x2xf32> to vector<16x16x2xf32>
    %c0_46 = arith.constant 0 : index
    %c1_47 = arith.constant 1 : index
    %c0_48 = arith.constant 0 : index
    %c2_49 = arith.constant 2 : index
    %75 = vector.load %arg11[%c0_46, %c1_47, %c0_48, %c2_49] : memref<16x2x16x4xf32, #tpu.memory_space<vmem>>, vector<16x1x16x2xf32>
    %76 = vector.shape_cast %75 : vector<16x1x16x2xf32> to vector<16x16x2xf32>
    %77 = vector.shape_cast %74 : vector<16x16x2xf32> to vector<16x1x16x2xf32>
    tpu.vector_store %arg11[%c0_46, %c1_47, %c0_48, %c2_49], %77 {strides = array<i32>} : memref<16x2x16x4xf32, #tpu.memory_space<vmem>>, vector<16x1x16x2xf32>,
    return
  }
  func.func @transform_0(%arg0: i32, %arg1: i32) -> (i32, i32, i32, i32) {
    %c0_i32 = arith.constant 0 : i32
    %c0_i32_0 = arith.constant 0 : i32
    %c0_i32_1 = arith.constant 0 : i32
    return %arg0, %arg1, %c0_i32, %c0_i32_0 : i32, i32, i32, i32
  }
  func.func @transform_1(%arg0: i32, %arg1: i32) -> (i32, i32, i32, i32) {
    %c0_i32 = arith.constant 0 : i32
    %c0_i32_0 = arith.constant 0 : i32
    %c0_i32_1 = arith.constant 0 : i32
    return %arg0, %arg1, %c0_i32, %c0_i32_0 : i32, i32, i32, i32
  }
  func.func @transform_2(%arg0: i32, %arg1: i32) -> (i32, i32, i32, i32) {
    %c0_i32 = arith.constant 0 : i32
    %c0_i32_0 = arith.constant 0 : i32
    %c0_i32_1 = arith.constant 0 : i32
    return %arg0, %arg1, %c0_i32, %c0_i32_0 : i32, i32, i32, i32
  }
  func.func @transform_3(%arg0: i32, %arg1: i32) -> (i32, i32, i32, i32) {
    %c0_i32 = arith.constant 0 : i32
    %c0_i32_0 = arith.constant 0 : i32
    %c0_i32_1 = arith.constant 0 : i32
    return %arg0, %arg1, %c0_i32, %c0_i32_0 : i32, i32, i32, i32
  }
  func.func @transform_4(%arg0: i32, %arg1: i32) -> (i32, i32) {
    %c0_i32 = arith.constant 0 : i32
    %c0_i32_0 = arith.constant 0 : i32
    %c0_i32_1 = arith.constant 0 : i32
    return %c0_i32, %c0_i32_0 : i32, i32
  }
  func.func @transform_5(%arg0: i32, %arg1: i32) -> (i32, i32) {
    %c0_i32 = arith.constant 0 : i32
    %c0_i32_0 = arith.constant 0 : i32
    %c0_i32_1 = arith.constant 0 : i32
    return %c0_i32, %c0_i32_0 : i32, i32
  }
  func.func @transform_6(%arg0: i32, %arg1: i32) -> (i32, i32) {
    %c0_i32 = arith.constant 0 : i32
    %c0_i32_0 = arith.constant 0 : i32
    %c0_i32_1 = arith.constant 0 : i32
    return %c0_i32, %c0_i32_0 : i32, i32
  }
  func.func @transform_7(%arg0: i32, %arg1: i32) -> (i32, i32) {
    %c0_i32 = arith.constant 0 : i32
    %c0_i32_0 = arith.constant 0 : i32
    %c0_i32_1 = arith.constant 0 : i32
    return %c0_i32, %c0_i32_0 : i32, i32
  }
  func.func @transform_8(%arg0: i32, %arg1: i32) -> (i32, i32) {
    %c0_i32 = arith.constant 0 : i32
    %c0_i32_0 = arith.constant 0 : i32
    %c0_i32_1 = arith.constant 0 : i32
    return %c0_i32, %c0_i32_0 : i32, i32
  }
  func.func @transform_9(%arg0: i32, %arg1: i32) -> (i32, i32, i32, i32) {
    %c1_i32 = arith.constant 1 : i32
    %0 = arith.muli %arg0, %c1_i32 : i32
    %1 = arith.addi %0, %arg1 : i32
    %c0_i32 = arith.constant 0 : i32
    %c0_i32_0 = arith.constant 0 : i32
    %c0_i32_1 = arith.constant 0 : i32
    %c0_i32_2 = arith.constant 0 : i32
    return %1, %c0_i32, %c0_i32_0, %c0_i32_1 : i32, i32, i32, i32
  }
}

</mosaic_0001>

<bundles_post_ra>
// kernel: upsample_forward.1
= control target key start
LH: loop header
LB: loop body
LE: loop exit
PB: predicated region body
PF: predicated region fallthrough
CT: control target
= control target key end

     0   :  { %s3777_s30 = smov 0   ;;  %s3779_s10 = smov 0   ;;  %s5053_s0 = inlined_call_operand.vmem [shape: bf16[2,16,16,4], index: 0, kind: input, shape index: {}]   ;;  %s5054_s1 = inlined_call_operand.vmem [shape: bf16[2,16,16,4], index: 1, kind: input, shape index: {}]   ;;  %s5055_s2 = inlined_call_operand.vmem [shape: bf16[2,16,16,4], index: 2, kind: input, shape index: {}]   ;;  %s5056_s3 = inlined_call_operand.vmem [shape: bf16[2,16,16,4], index: 3, kind: input, shape index: {}]   ;;  %s5057_s4 = inlined_call_operand.vmem [shape: bf16[4,8], index: 4, kind: input, shape index: {}]   ;;  %s5058_s5 = inlined_call_operand.vmem [shape: bf16[4,4], index: 5, kind: input, shape index: {}]   ;;  %s5059_s6 = inlined_call_operand.vmem [shape: bf16[4,4], index: 6, kind: input, shape index: {}]   ;;  %s5060_s7 = inlined_call_operand.vmem [shape: bf16[4,2], index: 7, kind: input, shape index: {}]   ;;  %s5061_s8 = inlined_call_operand.vmem [shape: f32[1,2], index: 8, kind: input, shape index: {}]   ;;  %s5062_s9 = inlined_call_operand.vmem [shape: f32[32,2,16,4], index: 9, kind: output, shape index: {}]  }
   0x1   :  { %s3781_s11 = smov 0  }
   0x2 LB: > { %s31_s12 = sadd.s32 1, %s3717_s10  ;;  %p3202_p0 = scmp.ge.s32.totalorder %s3721_s11, 1  ;;  %s3721_s11 = sphi %s3781_s11, %s19_s11   ;;  %s3717_s10 = sphi %s3779_s10, %s5136_s10   ;;  %s3713_s30 = sphi %s3777_s30, %s5135_s30  }
   0x3   : > { %p33_p1 = scmp.ge.s32.totalorder %s31_s12, 2  ;;  %p363_p2 = scmp.lt.s32.totalorder %s3721_s11, 3 }
   0x5   : > { %s5138_s12 = smov (%p33_p1, %s31_s12), 0  ;;  %p364_p3 = pnand %p3202_p0, %p363_p2 }
   0x7   : > { %367 = sbr.rel (%p364_p3) target bundleno = 895 (0x37f), region = 56 }
   0xc   : > { %vm748_vm0 = vcmask 1041408   ;;  %v841_v0 = vld [vmem:[%s5058_s5] sm:$0x3]  ;;  %p437_p4 = scmp.lt.s32.totalorder %s3713_s30, 1  ;;  %vm699_vm1 = vcmask 31744   ;;  %s3724_s21 = smov 2  }
   0xd   : > { %v1062_v1 = vld [vmem:[%s5059_s6] sm:$0x3]  ;;  %v971_v2 = vsel %vm748_vm0, %v841_v0, 0  ;;  %s3725_s22 = smov 6   ;;  %s3211_s24 = sshll.u32 %s3713_s30, 4  ;;  %vm2276_vm3 = vcmask 15360  }
   0xe   : > { %v1192_v3 = vsel %vm748_vm0, %v1062_v1, 0  ;;  %v1283_v4 = vld [vmem:[%s5060_s7] sm:$0x3]  ;;  %980 = vmatpush.bf16.msra.mxu1 %v971_v2  ;;  %s438_s19 = scalar_select %p437_p4, %s3713_s30, 1  ;;  %vm2440_vm9 = vcmask 31760  }
   0xf   : > { %1201 = vmatpush.bf16.msra.mxu2 %v1192_v3  ;;  %v1413_v5 = vsel %vm748_vm0, %v1283_v4, 0  ;;  %v618_v15 = vld [vmem:[%s5057_s4] sm:$0x3]  ;;  %p482_p5 = scmp.lt.s32.totalorder %s3211_s24, 31  ;;  %s3726_s13 = smov 124  }
  0x10   : > { %1422 = vmatpush.bf16.msra.mxu3 %v1413_v5  ;;  %s3600_s20 = sshll.u32 %s438_s19, 7  ;;  %v750_v16 = vsel %vm748_vm0, %v618_v15, 0  ;;  %v3864_v21 = vld [vmem:[%s5061_s8] ss:$0 sm:$0xff] }
  0x11   : > { %s3814_s23 = scalar_lea.vmem %s5054_s1, %s3600_s20  ;;  %s3819_s26 = scalar_lea.vmem %s5055_s2, %s3600_s20  ;;  %759 = vmatpush.bf16.msra.mxu0 %v750_v16  ;;  %2309 = vrot.lane.b32.xlu2 %v3864_v21, %s3724_s21 }
  0x12   : > { %v3621_v6 = vld [vmem:[%s3814_s23] sm:$0xff]  ;;  %s3826_s29 = scalar_lea.vmem %s5056_s3, %s3600_s20  ;;  %v3638_v9 = vld [vmem:[%s3819_s26 + $0x8] sm:$0xff]  ;;  %v3639_v12 = vld [vmem:[%s3819_s26 + $0x10] sm:$0xff]  ;;  %s3844_s15 = scalar_lea.vmem %s5053_s0, %s3600_s20 }
  0x13   : > { %v3637_v7 = vld [vmem:[%s3819_s26] sm:$0xff]  ;;  %3358 = vmatmul.msk.bf16.vlgmr.msra.gmra.mxu1 %vm699_vm1, %v3621_v6  ;;  %v3622_v10 = vld [vmem:[%s3814_s23 + $0x8] sm:$0xff]  ;;  %v3623_v13 = vld [vmem:[%s3814_s23 + $0x10] sm:$0xff]  ;;  %s3723_s20 = smov 4   ;;  %s5140_s24 = smov (!%p482_p5, %s3211_s24), 31 }
  0x14   : > { %v3653_v8 = vld [vmem:[%s3826_s29] sm:$0xff]  ;;  %3438 = vmatmul.msk.bf16.vlgmr.msra.gmra.mxu2 %vm699_vm1, %v3637_v7  ;;  %v3654_v11 = vld [vmem:[%s3826_s29 + $0x8] sm:$0xff]  ;;  %v3655_v14 = vld [vmem:[%s3826_s29 + $0x10] sm:$0xff]  ;;  %2473 = vrot.lane.b32.xlu0 %v3864_v21, %s3723_s20  ;;  %s3604_s30 = sshll.u32 %s5140_s24, 5 }
  0x15   : > { %3518 = vmatmul.msk.bf16.vlgmr.msra.gmra.mxu3 %vm699_vm1, %v3653_v8  ;;  %v3605_v17 = vld [vmem:[%s3844_s15] sm:$0xff]  ;;  %v3624_v18 = vld [vmem:[%s3814_s23 + $0x18] sm:$0xff]  ;;  %v3606_v22 = vld [vmem:[%s3844_s15 + $0x8] sm:$0xff]  ;;  %s3954_s28 = scalar_lea.vmem %s5062_s9, %s3604_s30 }
  0x16   : > { %3278 = vmatmul.msk.bf16.vlgmr.msra.gmra.mxu0 %vm699_vm1, %v3605_v17  ;;  %v3640_v19 = vld [vmem:[%s3819_s26 + $0x18] sm:$0xff]  ;;  %v3625_v23 = vld [vmem:[%s3814_s23 + $0x20] sm:$0xff]  ;;  %v3642_v26 = vld [vmem:[%s3819_s26 + $0x28] sm:$0xff] }
  0x17   : > { %v3656_v20 = vld [vmem:[%s3826_s29 + $0x18] sm:$0xff]  ;;  %v3641_v24 = vld [vmem:[%s3819_s26 + $0x20] sm:$0xff]  ;;  %v3626_v27 = vld [vmem:[%s3814_s23 + $0x28] sm:$0xff] }
  0x18   : > { %v3657_v25 = vld [vmem:[%s3826_s29 + $0x20] sm:$0xff]  ;;  %v3658_v28 = vld [vmem:[%s3826_s29 + $0x28] sm:$0xff]  ;;  %v3627_v29 = vld [vmem:[%s3814_s23 + $0x30] sm:$0xff] }
  0x19   : > { %v3643_v30 = vld [vmem:[%s3819_s26 + $0x30] sm:$0xff]  ;;  %v3628_v33 = vld [vmem:[%s3814_s23 + $0x38] sm:$0xff]  ;;  %v3645_v38 = vld [vmem:[%s3819_s26 + $0x40] sm:$0xff] }
  0x1a   : > { %v3659_v31 = vld [vmem:[%s3826_s29 + $0x30] sm:$0xff]  ;;  %v3644_v34 = vld [vmem:[%s3819_s26 + $0x38] sm:$0xff]  ;;  %v3629_v42 = vld [vmem:[%s3814_s23 + $0x40] sm:$0xff] }
  0x1b   : > { %v3607_v32 = vld [vmem:[%s3844_s15 + $0x10] sm:$0xff]  ;;  %v3660_v35 = vld [vmem:[%s3826_s29 + $0x38] sm:$0xff]  ;;  %v3609_v46 = vld [vmem:[%s3844_s15 + $0x20] sm:$0xff] }
  0x1c   : > { %v3608_v37 = vld [vmem:[%s3844_s15 + $0x18] sm:$0xff]  ;;  %v3661_v47 = vld [vmem:[%s3826_s29 + $0x40] sm:$0xff]  ;;  %v3630_v50 = vld [vmem:[%s3814_s23 + $0x48] sm:$0xff] }
  0x1d   : > { %v3646_v53 = vld [vmem:[%s3819_s26 + $0x48] sm:$0xff]  ;;  %v3631_v61 = vld [vmem:[%s3814_s23 + $0x50] sm:$0xff] }
  0x1e   : > { %v3662_v54 = vld [vmem:[%s3826_s29 + $0x48] sm:$0xff]  ;;  %v3611_v3 = vld [vmem:[%s3844_s15 + $0x30] sm:$0xff] }
  0x1f   : > { %v3610_v57 = vld [vmem:[%s3844_s15 + $0x28] sm:$0xff]  ;;  %v3647_v4 = vld [vmem:[%s3819_s26 + $0x50] sm:$0xff] }
  0x20   : > { %v3663_v5 = vld [vmem:[%s3826_s29 + $0x50] sm:$0xff] }
  0x23   : > { %3359 = vmatmul.msk.bf16.gmra.mxu1 %vm699_vm1, %v3622_v10 }
  0x24   : > { %3439 = vmatmul.msk.bf16.gmra.mxu2 %vm699_vm1, %v3638_v9 }
  0x25   : > { %3519 = vmatmul.msk.bf16.gmra.mxu3 %vm699_vm1, %v3654_v11 }
  0x26   : > { %3279 = vmatmul.msk.bf16.gmra.mxu0 %vm699_vm1, %v3606_v22 }
  0x33   : > { %3360 = vmatmul.msk.bf16.gmra.mxu1 %vm699_vm1, %v3623_v13 }
  0x34   : > { %3440 = vmatmul.msk.bf16.gmra.mxu2 %vm699_vm1, %v3639_v12 }
  0x35   : > { %3520 = vmatmul.msk.bf16.gmra.mxu3 %vm699_vm1, %v3655_v14 }
  0x36   : > { %3280 = vmatmul.msk.bf16.gmra.mxu0 %vm699_vm1, %v3607_v32 }
  0x43   : > { %3361 = vmatmul.msk.bf16.gmra.mxu1 %vm699_vm1, %v3624_v18  ;;  %v3612_v18 = vld [vmem:[%s3844_s15 + $0x38] sm:$0xff] }
  0x44   : > { %3441 = vmatmul.msk.bf16.gmra.mxu2 %vm699_vm1, %v3640_v19  ;;  %v3648_v19 = vld [vmem:[%s3819_s26 + $0x58] sm:$0xff] }
  0x45   : > { %3521 = vmatmul.msk.bf16.gmra.mxu3 %vm699_vm1, %v3656_v20 }
  0x46   : > { %3281 = vmatmul.msk.bf16.gmra.mxu0 %vm699_vm1, %v3608_v37 }
  0x53   : > { %3362 = vmatmul.msk.bf16.gmra.mxu1 %vm699_vm1, %v3625_v23 }
  0x54   : > { %3442 = vmatmul.msk.bf16.gmra.mxu2 %vm699_vm1, %v3641_v24 }
  0x55   : > { %3522 = vmatmul.msk.bf16.gmra.mxu3 %vm699_vm1, %v3657_v25 }
  0x56   : > { %3282 = vmatmul.msk.bf16.gmra.mxu0 %vm699_vm1, %v3609_v46 }
  0x63   : > { %3363 = vmatmul.msk.bf16.gmra.mxu1 %vm699_vm1, %v3626_v27  ;;  %v3632_v27 = vld [vmem:[%s3814_s23 + $0x58] sm:$0xff] }
  0x64   : > { %3443 = vmatmul.msk.bf16.gmra.mxu2 %vm699_vm1, %v3642_v26 }
  0x65   : > { %3523 = vmatmul.msk.bf16.gmra.mxu3 %vm699_vm1, %v3658_v28 }
  0x66   : > { %3283 = vmatmul.msk.bf16.gmra.mxu0 %vm699_vm1, %v3610_v57 }
  0x6b   : > { %v3981_v24 = vpop.permute.xlu2 %2309 }
  0x73   : > { %3364 = vmatmul.msk.bf16.gmra.mxu1 %vm699_vm1, %v3627_v29 }
  0x74   : > { %3444 = vmatmul.msk.bf16.gmra.mxu2 %vm699_vm1, %v3643_v30 }
  0x75   : > { %3524 = vmatmul.msk.bf16.gmra.mxu3 %vm699_vm1, %v3659_v31 }
  0x76   : > { %3284 = vmatmul.msk.bf16.gmra.mxu0 %vm699_vm1, %v3611_v3 }
  0x83   : > { %3365 = vmatmul.msk.bf16.gmra.mxu1 %vm699_vm1, %v3628_v33 }
  0x84   : > { %3445 = vmatmul.msk.bf16.gmra.mxu2 %vm699_vm1, %v3644_v34 }
  0x85   : > { %3525 = vmatmul.msk.bf16.gmra.mxu3 %vm699_vm1, %v3660_v35  ;;  %v3664_v35 = vld [vmem:[%s3826_s29 + $0x58] sm:$0xff] }
  0x86   : > { %3285 = vmatmul.msk.bf16.gmra.mxu0 %vm699_vm1, %v3612_v18 }
  0x90   : > { %v982_v36 = vpop.f32.mrf.mxu1 }
  0x91   : > { %1824 = vrot.lane.b32.xlu1 %v982_v36, %s3723_s20  ;;  %1536 = vrot.lane.b32.xlu0 %v982_v36, %s3724_s21 }
  0x93   : > { %3366 = vmatmul.msk.bf16.gmra.mxu1 %vm699_vm1, %v3629_v42  ;;  %v3944_v1 = vpop.f32.mrf.mxu0  ;;  %v3613_v42 = vld [vmem:[%s3844_s15 + $0x40] sm:$0xff] }
  0x94   : > { %3446 = vmatmul.msk.bf16.gmra.mxu2 %vm699_vm1, %v3645_v38  ;;  %v2148_v2 = vadd.f32 %v3864_v21, %v3944_v1 }
  0x95   : > { %3526 = vmatmul.msk.bf16.gmra.mxu3 %vm699_vm1, %v3661_v47 }
  0x96   : > { %vm2180_vm2 = vcmp.gt.f32.partialorder %v2148_v2, 0.0  ;;  %v2212_v6 = vmul.f32 0.01, %v2148_v2  ;;  %3286 = vmatmul.msk.bf16.gmra.mxu0 %vm699_vm1, %v3613_v42 }
  0x97   : > { %v1203_v39 = vpop.f32.mrf.mxu2 }
  0x98   : > { %v1424_v40 = vpop.f32.mrf.mxu3  ;;  %1696 = vrot.lane.b32.xlu2 %v1203_v39, %s3723_s20  ;;  %v984_v41 = vpop.f32.mrf.mxu1  ;;  %v2244_v8 = vsel %vm2180_vm2, %v2148_v2, %v2212_v6 }
  0x99   : > { %2016 = vrot.lane.b32.xlu0 %v1424_v40, %s3725_s22  ;;  %2277 = vst.msk [vmem:[%s3954_s28] sm:$0xff] %vm2276_vm3, %v2244_v8  ;;  %v3633_v40 = vld [vmem:[%s3814_s23 + $0x60] sm:$0xff] }
  0x9b   : > { %v3964_v10 = vpop.f32.mrf.mxu0 }
  0x9c   : > { %v2149_v11 = vadd.f32 %v3864_v21, %v3964_v10 }
  0x9e   : > { %vm2181_vm4 = vcmp.gt.f32.partialorder %v2149_v11, 0.0  ;;  %v2213_v12 = vmul.f32 0.01, %v2149_v11 }
  0x9f   : > { %v1205_v43 = vpop.f32.mrf.mxu2 }
  0xa0   : > { %v1426_v44 = vpop.f32.mrf.mxu3  ;;  %1826 = vrot.lane.b32.xlu2 %v984_v41, %s3723_s20  ;;  %v987_v45 = vpop.f32.mrf.mxu1  ;;  %v2245_v14 = vsel %vm2181_vm4, %v2149_v11, %v2213_v12 }
  0xa1   : > { %2018 = vrot.lane.b32.xlu1 %v1426_v44, %s3725_s22  ;;  %1538 = vrot.lane.b32.xlu0 %v984_v41, %s3724_s21  ;;  %2278 = vst.msk [vmem:[%s3954_s28 + $0x8] sm:$0xff] %vm2276_vm3, %v2245_v14  ;;  %v4011_v41 = vpop.permute.xlu0 %2473 }
  0xa3   : > { %3367 = vmatmul.msk.bf16.gmra.mxu1 %vm699_vm1, %v3630_v50  ;;  %v3973_v16 = vpop.f32.mrf.mxu0 }
  0xa4   : > { %3447 = vmatmul.msk.bf16.gmra.mxu2 %vm699_vm1, %v3646_v53  ;;  %v2150_v17 = vadd.f32 %v3864_v21, %v3973_v16 }
  0xa5   : > { %3527 = vmatmul.msk.bf16.gmra.mxu3 %vm699_vm1, %v3662_v54  ;;  %v3649_v54 = vld [vmem:[%s3819_s26 + $0x60] sm:$0xff] }
  0xa6   : > { %vm2182_vm5 = vcmp.gt.f32.partialorder %v2150_v17, 0.0  ;;  %v2214_v20 = vmul.f32 0.01, %v2150_v17 }
  0xa7   : > { %v1208_v48 = vpop.f32.mrf.mxu2 }
  0xa8   : > { %v1429_v49 = vpop.f32.mrf.mxu3  ;;  %v989_v51 = vpop.f32.mrf.mxu1  ;;  %v2246_v25 = vsel %vm2182_vm5, %v2150_v17, %v2214_v20 }
  0xa9   : > { %2020 = vrot.lane.b32.xlu2 %v1429_v49, %s3725_s22  ;;  %1540 = vrot.lane.b32.xlu1 %v987_v45, %s3724_s21  ;;  %2279 = vst.msk [vmem:[%s3954_s28 + $0x20] sm:$0xff] %vm2276_vm3, %v2246_v25 }
  0xaa   : > { %1698 = vrot.lane.b32.xlu0 %v1205_v43, %s3723_s20 }
  0xab   : > { %v3988_v26 = vpop.f32.mrf.mxu0 }
  0xac   : > { %v2151_v28 = vadd.f32 %v3864_v21, %v3988_v26 }
  0xae   : > { %vm2183_vm6 = vcmp.gt.f32.partialorder %v2151_v28, 0.0  ;;  %v2215_v30 = vmul.f32 0.01, %v2151_v28 }
  0xaf   : > { %v1210_v52 = vpop.f32.mrf.mxu2 }
  0xb0   : > { %v992_v55 = vpop.f32.mrf.mxu1  ;;  %v1431_v56 = vpop.f32.mrf.mxu3  ;;  %v2247_v32 = vsel %vm2183_vm6, %v2151_v28, %v2215_v30  ;;  %v3634_v28 = vld [vmem:[%s3814_s23 + $0x68] sm:$0xff] }
  0xb1   : > { %1702 = vrot.lane.b32.xlu2 %v1210_v52, %s3723_s20  ;;  %1700 = vrot.lane.b32.xlu1 %v1208_v48, %s3723_s20  ;;  %2280 = vst.msk [vmem:[%s3954_s28 + $0x28] sm:$0xff] %vm2276_vm3, %v2247_v32  ;;  %v3614_v32 = vld [vmem:[%s3844_s15 + $0x48] sm:$0xff] }
  0xb2   : > { %1828 = vrot.lane.b32.xlu0 %v987_v45, %s3723_s20  ;;  %3287 = vmatmul.msk.bf16.gmra.mxu0 %vm699_vm1, %v3614_v32 }
  0xb3   : > { %3368 = vmatmul.msk.bf16.gmra.mxu1 %vm699_vm1, %v3631_v61  ;;  %v4008_v39 = vpop.f32.mrf.mxu0 }
  0xb4   : > { %3448 = vmatmul.msk.bf16.gmra.mxu2 %vm699_vm1, %v3647_v4  ;;  %v2152_v44 = vadd.f32 %v3864_v21, %v4008_v39 }
  0xb5   : > { %3528 = vmatmul.msk.bf16.gmra.mxu3 %vm699_vm1, %v3663_v5 }
  0xb6   : > { %v2216_v45 = vmul.f32 0.01, %v2152_v44  ;;  %vm2184_vm7 = vcmp.gt.f32.partialorder %v2152_v44, 0.0 }
  0xb7   : > { %v1213_v58 = vpop.f32.mrf.mxu2 }
  0xb8   : > { %v1434_v59 = vpop.f32.mrf.mxu3  ;;  %v994_v60 = vpop.f32.mrf.mxu1  ;;  %v2248_v47 = vsel %vm2184_vm7, %v2152_v44, %v2216_v45 }
  0xb9   : > { %1542 = vrot.lane.b32.xlu1 %v989_v51, %s3724_s21  ;;  %1544 = vrot.lane.b32.xlu2 %v992_v55, %s3724_s21  ;;  %2281 = vst.msk [vmem:[%s3954_s28 + $0x40] sm:$0xff] %vm2276_vm3, %v2248_v47 }
  0xba   : > { %2022 = vrot.lane.b32.xlu0 %v1431_v56, %s3725_s22 }
  0xbb   : > { %v4025_v49 = vpop.f32.mrf.mxu0 }
  0xbc   : > { %v2153_v53 = vadd.f32 %v3864_v21, %v4025_v49 }
  0xbe   : > { %vm2185_vm8 = vcmp.gt.f32.partialorder %v2153_v53, 0.0 }
  0xbf   : > { %v1215_v62 = vpop.f32.mrf.mxu2 }
  0xc0   : > { %v1436_v63 = vpop.f32.mrf.mxu3  ;;  %v997_v0 = vpop.f32.mrf.mxu1 }
  0xc1   : > { %1830 = vrot.lane.b32.xlu1 %v989_v51, %s3723_s20  ;;  %1832 = vrot.lane.b32.xlu2 %v992_v55, %s3723_s20  ;;  %v3665_v55 = vld [vmem:[%s3826_s29 + $0x60] sm:$0xff] }
  0xc2   : > { %1704 = vrot.lane.b32.xlu0 %v1213_v58, %s3723_s20  ;;  %v2217_v58 = vmul.f32 0.01, %v2153_v53 }
  0xc3   : > { %3369 = vmatmul.msk.bf16.gmra.mxu1 %vm699_vm1, %v3632_v27  ;;  %v4055_v11 = vpop.f32.mrf.mxu0 }
  0xc4   : > { %3449 = vmatmul.msk.bf16.gmra.mxu2 %vm699_vm1, %v3648_v19  ;;  %v2154_v17 = vadd.f32 %v3864_v21, %v4055_v11 }
  0xc5   : > { %3529 = vmatmul.msk.bf16.gmra.mxu3 %vm699_vm1, %v3664_v35 }
  0xc6   : > { %vm2186_vm13 = vcmp.gt.f32.partialorder %v2154_v17, 0.0 }
  0xc7   : > { %v1218_v7 = vpop.f32.mrf.mxu2 }
  0xc8   : > { %v1439_v9 = vpop.f32.mrf.mxu3  ;;  %v999_v13 = vpop.f32.mrf.mxu1 }
  0xc9   : > { %2024 = vrot.lane.b32.xlu1 %v1434_v59, %s3725_s22  ;;  %1546 = vrot.lane.b32.xlu2 %v994_v60, %s3724_s21 }
  0xca   : > { %1834 = vrot.lane.b32.xlu0 %v994_v60, %s3723_s20  ;;  %v2249_v60 = vsel %vm2185_vm8, %v2153_v53, %v2217_v58  ;;  %v3650_v53 = vld [vmem:[%s3819_s26 + $0x68] sm:$0xff] }
  0xcb   : > { %2282 = vst.msk [vmem:[%s3954_s28 + $0x48] sm:$0xff] %vm2276_vm3, %v2249_v60 }
  0xcf   : > { %v1220_v15 = vpop.f32.mrf.mxu2 }
  0xd0   : > { %v1441_v22 = vpop.f32.mrf.mxu3  ;;  %v1002_v23 = vpop.f32.mrf.mxu1 }
  0xd1   : > { %1706 = vrot.lane.b32.xlu1 %v1215_v62, %s3723_s20  ;;  %2026 = vrot.lane.b32.xlu2 %v1436_v63, %s3725_s22 }
  0xd2   : > { %1548 = vrot.lane.b32.xlu0 %v997_v0, %s3724_s21 }
  0xd3   : > { %3370 = vmatmul.msk.bf16.gmra.mxu1 %vm699_vm1, %v3633_v40 }
  0xd4   : > { %3450 = vmatmul.msk.bf16.gmra.mxu2 %vm699_vm1, %v3649_v54  ;;  %v3666_v54 = vld [vmem:[%s3826_s29 + $0x68] sm:$0xff] }
  0xd5   : > { %3530 = vmatmul.msk.bf16.gmra.mxu3 %vm699_vm1, %v3665_v55 }
  0xd7   : > { %v1223_v29 = vpop.f32.mrf.mxu2 }
  0xd8   : > { %v1444_v31 = vpop.f32.mrf.mxu3  ;;  %v1004_v33 = vpop.f32.mrf.mxu1 }
  0xd9   : > { %1708 = vrot.lane.b32.xlu2 %v1218_v7, %s3723_s20  ;;  %1836 = vrot.lane.b32.xlu1 %v997_v0, %s3723_s20 }
  0xda   : > { %2028 = vrot.lane.b32.xlu0 %v1439_v9, %s3725_s22 }
  0xdf   : > { %v1225_v36 = vpop.f32.mrf.mxu2 }
  0xe0   : > { %v1446_v37 = vpop.f32.mrf.mxu3  ;;  %v1007_v43 = vpop.f32.mrf.mxu1 }
  0xe1   : > { %1838 = vrot.lane.b32.xlu2 %v999_v13, %s3723_s20  ;;  %1550 = vrot.lane.b32.xlu1 %v999_v13, %s3724_s21 }
  0xe2   : > { %1710 = vrot.lane.b32.xlu0 %v1220_v15, %s3723_s20 }
  0xe3   : > { %3371 = vmatmul.msk.bf16.gmra.mxu1 %vm699_vm1, %v3634_v28 }
  0xe4   : > { %3451 = vmatmul.msk.bf16.gmra.mxu2 %vm699_vm1, %v3650_v53 }
  0xe5   : > { %3531 = vmatmul.msk.bf16.gmra.mxu3 %vm699_vm1, %v3666_v54 }
  0xe7   : > { %v1228_v46 = vpop.f32.mrf.mxu2 }
  0xe8   : > { %v1449_v51 = vpop.f32.mrf.mxu3  ;;  %v1009_v56 = vpop.f32.mrf.mxu1 }
  0xe9   : > { %2030 = vrot.lane.b32.xlu1 %v1441_v22, %s3725_s22  ;;  %1552 = vrot.lane.b32.xlu2 %v1002_v23, %s3724_s21  ;;  %v2218_v22 = vmul.f32 0.01, %v2154_v17 }
  0xea   : > { %1840 = vrot.lane.b32.xlu0 %v1002_v23, %s3723_s20 }
  0xef   : > { %v1230_v2 = vpop.f32.mrf.mxu2 }
  0xf0   : > { %v1451_v3 = vpop.f32.mrf.mxu3  ;;  %v1012_v4 = vpop.f32.mrf.mxu1 }
  0xf1   : > { %1712 = vrot.lane.b32.xlu1 %v1223_v29, %s3723_s20  ;;  %2032 = vrot.lane.b32.xlu2 %v1444_v31, %s3725_s22  ;;  %v2250_v31 = vsel %vm2186_vm13, %v2154_v17, %v2218_v22 }
  0xf2   : > { %v3998_v34 = vpop.permute.xlu2 %1696  ;;  %1554 = vrot.lane.b32.xlu0 %v1004_v33, %s3724_s21  ;;  %2283 = vst.msk [vmem:[%s3954_s28 + $0x60] sm:$0xff] %vm2276_vm3, %v2250_v31 }
  0xf7   : > { %v1233_v13 = vpop.f32.mrf.mxu2 }
  0xf8   : > { %v1454_v18 = vpop.f32.mrf.mxu3 }
  0xf9   : > { %1714 = vrot.lane.b32.xlu2 %v1225_v36, %s3723_s20  ;;  %1842 = vrot.lane.b32.xlu1 %v1004_v33, %s3723_s20  ;;  %v4077_v33 = vpop.f32.mrf.mxu0 }
  0xfa   : > { %v4005_v38 = vpop.permute.xlu2 %1826  ;;  %2034 = vrot.lane.b32.xlu0 %v1446_v37, %s3725_s22  ;;  %5067 = vst [vmem:[#allocation2_spill] sm:$0xff] %v4077_v33  ;;  %v2155_v36 = vadd.f32 %v3864_v21, %v4077_v33  ;;  %v1014_v37 = vpop.f32.mrf.mxu1 }
  0xfc   : > { %vm2187_vm15 = vcmp.gt.f32.partialorder %v2155_v36, 0.0  ;;  %v2219_v42 = vmul.f32 0.01, %v2155_v36 }
  0xfe   : > { %v2251_v45 = vsel %vm2187_vm15, %v2155_v36, %v2219_v42 }
  0xff   : > { %2284 = vst.msk [vmem:[%s3954_s28 + $0x68] sm:$0xff] %vm2276_vm3, %v2251_v45 }
 0x101   : > { %1844 = vrot.lane.b32.xlu2 %v1007_v43, %s3723_s20  ;;  %1556 = vrot.lane.b32.xlu1 %v1007_v43, %s3724_s21  ;;  %v1235_v43 = vpop.f32.mrf.mxu2 }
 0x102   : > { %1716 = vrot.lane.b32.xlu0 %v1228_v46, %s3723_s20  ;;  %v1017_v58 = vpop.f32.mrf.mxu1 }
 0x103   : > { %v4023_v48 = vpop.permute.xlu2 %2020  ;;  %v1537_v50 = vpop.permute.xlu0 %1536 }
 0x104   : > { %v1632_v52 = vadd.f32 %v1537_v50, %v3944_v1  ;;  %v4040_v61 = vpop.permute.xlu1 %1824 }
 0x106   : > { %v2312_v57 = vadd.f32 %v3981_v24, %v1632_v52  ;;  %v4096_v52 = vpop.f32.mrf.mxu0 }
 0x108   : > { %vm2344_vm10 = vcmp.gt.f32.partialorder %v2312_v57, 0.0  ;;  %v2376_v59 = vmul.f32 0.01, %v2312_v57 }
 0x109   : > { %2036 = vrot.lane.b32.xlu1 %v1449_v51, %s3725_s22  ;;  %1558 = vrot.lane.b32.xlu2 %v1009_v56, %s3724_s21 }
 0x10a   : > { %1846 = vrot.lane.b32.xlu0 %v1009_v56, %s3723_s20  ;;  %v2408_v62 = vsel %vm2344_vm10, %v2312_v57, %v2376_v59  ;;  %v2156_v56 = vadd.f32 %v3864_v21, %v4096_v52  ;;  %v1456_v57 = vpop.f32.mrf.mxu3 }
 0x10b   : > { %v4042_v63 = vpop.permute.xlu2 %1702  ;;  %2441 = vst.msk [vmem:[%s3954_s28] sm:$0xff] %vm2440_vm9, %v2408_v62  ;;  %v4046_v0 = vpop.permute.xlu0 %2016 }
 0x10c   : > { %vm2188_vm2 = vcmp.gt.f32.partialorder %v2156_v56, 0.0  ;;  %v2220_v60 = vmul.f32 0.01, %v2156_v56 }
 0x10e   : > { %v4131_v22 = vpop.f32.mrf.mxu0 }
 0x111   : > { %1718 = vrot.lane.b32.xlu1 %v1230_v2, %s3723_s20  ;;  %2038 = vrot.lane.b32.xlu2 %v1451_v3, %s3725_s22  ;;  %v2252_v2 = vsel %vm2188_vm2, %v2156_v56, %v2220_v60 }
 0x112   : > { %1560 = vrot.lane.b32.xlu0 %v1012_v4, %s3724_s21  ;;  %2285 = vst.msk [vmem:[%s3954_s28 + $0x80] sm:$0xff] %vm2276_vm3, %v2252_v2 }
 0x113   : > { %v4051_v5 = vpop.permute.xlu1 %2018  ;;  %v1545_v6 = vpop.permute.xlu2 %1544 }
 0x114   : > { %v1539_v7 = vpop.permute.xlu0 %1538  ;;  %v1636_v8 = vadd.f32 %v1545_v6, %v4008_v39 }
 0x115   : > { %v1633_v9 = vadd.f32 %v1539_v7, %v3964_v10 }
 0x116   : > { %v2316_v12 = vadd.f32 %v3981_v24, %v1636_v8  ;;  %v3615_v8 = vld [vmem:[%s3844_s15 + $0x50] sm:$0xff] }
 0x117   : > { %v2313_v14 = vadd.f32 %v3981_v24, %v1633_v9  ;;  %v1238_v9 = vpop.f32.mrf.mxu2  ;;  %3288 = vmatmul.msk.bf16.gmra.mxu0 %vm699_vm1, %v3615_v8  ;;  %v3667_v8 = vld [vmem:[%s3826_s29 + $0x70] sm:$0xff] }
 0x118   : > { %vm2348_vm11 = vcmp.gt.f32.partialorder %v2316_v12, 0.0  ;;  %v2380_v15 = vmul.f32 0.01, %v2316_v12  ;;  %3532 = vmatmul.msk.bf16.gmra.mxu3 %vm699_vm1, %v3667_v8  ;;  %v3652_v8 = vld [vmem:[%s3819_s26 + $0x78] sm:$0xff] }
 0x119   : > { %vm2345_vm12 = vcmp.gt.f32.partialorder %v2313_v14, 0.0  ;;  %v2377_v19 = vmul.f32 0.01, %v2313_v14  ;;  %1720 = vrot.lane.b32.xlu2 %v1233_v13, %s3723_s20  ;;  %1848 = vrot.lane.b32.xlu1 %v1012_v4, %s3723_s20  ;;  %v1459_v13 = vpop.f32.mrf.mxu3 }
 0x11a   : > { %2040 = vrot.lane.b32.xlu0 %v1454_v18, %s3725_s22  ;;  %v2412_v20 = vsel %vm2348_vm11, %v2316_v12, %v2380_v15  ;;  %v1019_v15 = vpop.f32.mrf.mxu1 }
 0x11b   : > { %v2409_v23 = vsel %vm2345_vm12, %v2313_v14, %v2377_v19  ;;  %v1541_v25 = vpop.permute.xlu1 %1540  ;;  %v4064_v27 = vpop.permute.xlu2 %1832  ;;  %2445 = vst.msk [vmem:[%s3954_s28 + $0x40] sm:$0xff] %vm2440_vm9, %v2412_v20 }
 0x11c   : > { %2442 = vst.msk [vmem:[%s3954_s28 + $0x8] sm:$0xff] %vm2440_vm9, %v2409_v23  ;;  %v1634_v29 = vadd.f32 %v1541_v25, %v3973_v16  ;;  %v4072_v30 = vpop.permute.xlu0 %1698  ;;  %v3651_v23 = vld [vmem:[%s3819_s26 + $0x70] sm:$0xff] }
 0x11d   : > { %3452 = vmatmul.msk.bf16.gmra.mxu2 %vm699_vm1, %v3651_v23 }
 0x11e   : > { %v2314_v35 = vadd.f32 %v3981_v24, %v1634_v29  ;;  %v1792_v29 = vadd.f32 %v3998_v34, %v3944_v1 }
 0x11f   : > { %v1240_v25 = vpop.f32.mrf.mxu2 }
 0x120   : > { %vm2346_vm14 = vcmp.gt.f32.partialorder %v2314_v35, 0.0  ;;  %v2378_v40 = vmul.f32 0.01, %v2314_v35  ;;  %v2476_v45 = vadd.f32 %v4011_v41, %v1792_v29 }
 0x121   : > { %1850 = vrot.lane.b32.xlu2 %v1014_v37, %s3723_s20  ;;  %1562 = vrot.lane.b32.xlu1 %v1014_v37, %s3724_s21  ;;  %v1461_v28 = vpop.f32.mrf.mxu3  ;;  %v4148_v37 = vpop.f32.mrf.mxu0 }
 0x122   : > { %v2410_v44 = vsel %vm2346_vm14, %v2314_v35, %v2378_v40  ;;  %1722 = vrot.lane.b32.xlu0 %v1235_v43, %s3723_s20  ;;  %v2157_v35 = vadd.f32 %v3864_v21, %v4131_v22  ;;  %v3635_v40 = vld [vmem:[%s3814_s23 + $0x70] sm:$0xff]  ;;  %v1022_v42 = vpop.f32.mrf.mxu1  ;;  %vm2508_vm7 = vcmp.gt.f32.partialorder %v2476_v45, 0.0 }
 0x123   : > { %2443 = vst.msk [vmem:[%s3954_s28 + $0x20] sm:$0xff] %vm2440_vm9, %v2410_v44  ;;  %v4089_v46 = vpop.permute.xlu1 %1700  ;;  %v1547_v47 = vpop.permute.xlu2 %1546  ;;  %v2158_v44 = vadd.f32 %v3864_v21, %v4148_v37  ;;  %3372 = vmatmul.msk.bf16.gmra.mxu1 %vm699_vm1, %v3635_v40 }
 0x124   : > { %v1637_v50 = vadd.f32 %v1547_v47, %v4025_v49  ;;  %v4092_v51 = vpop.permute.xlu0 %1828  ;;  %vm2189_vm5 = vcmp.gt.f32.partialorder %v2157_v35, 0.0  ;;  %v2221_v43 = vmul.f32 0.01, %v2157_v35 }
 0x125   : > { %vm2190_vm6 = vcmp.gt.f32.partialorder %v2158_v44, 0.0 }
 0x126   : > { %v2317_v55 = vadd.f32 %v3981_v24, %v1637_v50  ;;  %v2253_v47 = vsel %vm2189_vm5, %v2157_v35, %v2221_v43  ;;  %v2222_v50 = vmul.f32 0.01, %v2158_v44 }
 0x127   : > { %2286 = vst.msk [vmem:[%s3954_s28 + $0x88] sm:$0xff] %vm2276_vm3, %v2253_v47  ;;  %v1243_v53 = vpop.f32.mrf.mxu2 }
 0x128   : > { %vm2349_vm0 = vcmp.gt.f32.partialorder %v2317_v55, 0.0  ;;  %v2381_v59 = vmul.f32 0.01, %v2317_v55  ;;  %v2254_v54 = vsel %vm2190_vm6, %v2158_v44, %v2222_v50  ;;  %v3636_v44 = vld [vmem:[%s3814_s23 + $0x78] sm:$0xff] }
 0x129   : > { %2042 = vrot.lane.b32.xlu1 %v1456_v57, %s3725_s22  ;;  %1564 = vrot.lane.b32.xlu2 %v1017_v58, %s3724_s21  ;;  %2287 = vst.msk [vmem:[%s3954_s28 + $0xa0] sm:$0xff] %vm2276_vm3, %v2254_v54  ;;  %v1464_v47 = vpop.f32.mrf.mxu3  ;;  %v3616_v50 = vld [vmem:[%s3844_s15 + $0x58] sm:$0xff] }
 0x12a   : > { %v2413_v62 = vsel %vm2349_vm0, %v2317_v55, %v2381_v59  ;;  %1852 = vrot.lane.b32.xlu0 %v1017_v58, %s3723_s20  ;;  %v1793_v55 = vadd.f32 %v4072_v30, %v3964_v10  ;;  %v2540_v58 = vmul.f32 0.01, %v2476_v45  ;;  %3289 = vmatmul.msk.bf16.gmra.mxu0 %vm699_vm1, %v3616_v50 }
 0x12b   : > { %2446 = vst.msk [vmem:[%s3954_s28 + $0x48] sm:$0xff] %vm2440_vm9, %v2413_v62  ;;  %v1543_v3 = vpop.permute.xlu1 %1542  ;;  %v4110_v4 = vpop.permute.xlu2 %2026 }
 0x12c   : > { %v1635_v6 = vadd.f32 %v1543_v3, %v3988_v26  ;;  %v4113_v7 = vpop.permute.xlu0 %2022  ;;  %v4167_v62 = vpop.f32.mrf.mxu0 }
 0x12d   : > { %5068 = vst [vmem:[#allocation3_spill] sm:$0xff] %v4113_v7  ;;  %3453 = vmatmul.msk.bf16.gmra.mxu2 %vm699_vm1, %v3652_v8 }
 0x12e   : > { %v2315_v12 = vadd.f32 %v3981_v24, %v1635_v6  ;;  %v2159_v6 = vadd.f32 %v3864_v21, %v4167_v62 }
 0x130   : > { %vm2347_vm4 = vcmp.gt.f32.partialorder %v2315_v12, 0.0  ;;  %v2379_v14 = vmul.f32 0.01, %v2315_v12  ;;  %vm2191_vm10 = vcmp.gt.f32.partialorder %v2159_v6, 0.0 }
 0x131   : > { %1724 = vrot.lane.b32.xlu1 %v1238_v9, %s3723_s20  ;;  %2044 = vrot.lane.b32.xlu2 %v1459_v13, %s3725_s22  ;;  %v2477_v9 = vadd.f32 %v4011_v41, %v1793_v55 }
 0x132   : > { %v2411_v17 = vsel %vm2347_vm4, %v2315_v12, %v2379_v14  ;;  %1566 = vrot.lane.b32.xlu0 %v1019_v15, %s3724_s21  ;;  %v1024_v12 = vpop.f32.mrf.mxu1  ;;  %v2572_v14 = vsel %vm2508_vm7, %v2476_v45, %v2540_v58  ;;  %v1794_v45 = vadd.f32 %v4089_v46, %v3973_v16 }
 0x133   : > { %2444 = vst.msk [vmem:[%s3954_s28 + $0x28] sm:$0xff] %vm2440_vm9, %v2411_v17  ;;  %v4125_v18 = vpop.permute.xlu1 %1830  ;;  %v4127_v19 = vpop.permute.xlu2 %1708  ;;  %v2223_v17 = vmul.f32 0.01, %v2159_v6  ;;  %v2541_v43 = vmul.f32 0.01, %v2477_v9  ;;  %vm2509_vm12 = vcmp.gt.f32.partialorder %v2477_v9, 0.0  ;;  %3373 = vmatmul.msk.bf16.gmra.mxu1 %vm699_vm1, %v3636_v44 }
 0x134   : > { %5069 = vst [vmem:[#allocation4_spill] sm:$0xff] %v4127_v19  ;;  %v4129_v20 = vpop.permute.xlu0 %1704  ;;  %v2478_v54 = vadd.f32 %v4011_v41, %v1794_v45 }
 0x136   : > { %vm2510_vm13 = vcmp.gt.f32.partialorder %v2478_v54, 0.0 }
 0x139   : > { %1726 = vrot.lane.b32.xlu2 %v1240_v25, %s3723_s20  ;;  %1854 = vrot.lane.b32.xlu1 %v1019_v15, %s3723_s20 }
 0x13a   : > { %2046 = vrot.lane.b32.xlu0 %v1461_v28, %s3725_s22  ;;  %v2255_v28 = vsel %vm2191_vm10, %v2159_v6, %v2223_v17  ;;  %v1027_v55 = vpop.f32.mrf.mxu1 }
 0x13b   : > { %v4140_v31 = vpop.permute.xlu1 %2024  ;;  %v4142_v32 = vpop.permute.xlu2 %1838  ;;  %2288 = vst.msk [vmem:[%s3954_s28 + $0xa8] sm:$0xff] %vm2276_vm3, %v2255_v28 }
 0x13c   : > { %5070 = vst [vmem:[#allocation5_spill] sm:$0xff] %v4142_v32  ;;  %v4146_v36 = vpop.permute.xlu0 %1834 }
 0x141   : > { %1856 = vrot.lane.b32.xlu2 %v1022_v42, %s3723_s20  ;;  %1568 = vrot.lane.b32.xlu1 %v1022_v42, %s3724_s21 }
 0x142   : > { %1728 = vrot.lane.b32.xlu0 %v1243_v53, %s3723_s20  ;;  %v2573_v53 = vsel %vm2509_vm12, %v2477_v9, %v2541_v43  ;;  %v3668_v9 = vld [vmem:[%s3826_s29 + $0x78] sm:$0xff] }
 0x143   : > { %v4164_v56 = vpop.permute.xlu1 %1706  ;;  %v1553_v57 = vpop.permute.xlu2 %1552  ;;  %3533 = vmatmul.msk.bf16.gmra.mxu3 %vm699_vm1, %v3668_v9 }
 0x144   : > { %v1640_v59 = vadd.f32 %v1553_v57, %v4096_v52  ;;  %v1549_v60 = vpop.permute.xlu0 %1548 }
 0x145   : > { %v1638_v2 = vadd.f32 %v1549_v60, %v4055_v11 }
 0x146   : > { %v2320_v3 = vadd.f32 %v3981_v24, %v1640_v59 }
 0x147   : > { %v2318_v13 = vadd.f32 %v3981_v24, %v1638_v2  ;;  %v2542_v2 = vmul.f32 0.01, %v2478_v54 }
 0x148   : > { %vm2352_vm8 = vcmp.gt.f32.partialorder %v2320_v3, 0.0  ;;  %v2384_v15 = vmul.f32 0.01, %v2320_v3 }
 0x149   : > { %vm2350_vm11 = vcmp.gt.f32.partialorder %v2318_v13, 0.0  ;;  %v2382_v23 = vmul.f32 0.01, %v2318_v13  ;;  %1570 = vrot.lane.b32.xlu2 %v1024_v12, %s3724_s21  ;;  %2636 = vrot.lane.b32.xlu1 %v2572_v14, %s3726_s13 }
 0x14a   : > { %v2416_v25 = vsel %vm2352_vm8, %v2320_v3, %v2384_v15  ;;  %1858 = vrot.lane.b32.xlu0 %v1024_v12, %s3723_s20  ;;  %v4207_v3 = vpop.f32.mrf.mxu0  ;;  %v1245_v12 = vpop.f32.mrf.mxu2  ;;  %v2574_v15 = vsel %vm2510_vm13, %v2478_v54, %v2542_v2 }
 0x14b   : > { %2449 = vst.msk [vmem:[%s3954_s28 + $0x80] sm:$0xff] %vm2440_vm9, %v2416_v25  ;;  %v2414_v29 = vsel %vm2350_vm11, %v2318_v13, %v2382_v23  ;;  %v4182_v35 = vpop.permute.xlu1 %1836  ;;  %v4184_v40 = vpop.permute.xlu2 %2032  ;;  %v2160_v28 = vadd.f32 %v3864_v21, %v4207_v3 }
 0x14c   : > { %5071 = vst [vmem:[#allocation6_spill] sm:$0xff] %v4182_v35  ;;  %v4188_v42 = vpop.permute.xlu0 %2028  ;;  %v1466_v13 = vpop.f32.mrf.mxu3 }
 0x14d   : > { %5072 = vst [vmem:[#allocation7_spill] sm:$0xff] %v4184_v40  ;;  %vm2192_vm15 = vcmp.gt.f32.partialorder %v2160_v28, 0.0  ;;  %v2224_v43 = vmul.f32 0.01, %v2160_v28 }
 0x14e   : > { %2447 = vst.msk [vmem:[%s3954_s28 + $0x60] sm:$0xff] %vm2440_vm9, %v2414_v29 }
 0x14f   : > { %5073 = vst [vmem:[#allocation8_spill] sm:$0xff] %v4188_v42  ;;  %v2256_v50 = vsel %vm2192_vm15, %v2160_v28, %v2224_v43 }
 0x150   : > { %2289 = vst.msk [vmem:[%s3954_s28 + $0xc0] sm:$0xff] %vm2276_vm3, %v2256_v50 }
 0x151   : > { %2048 = vrot.lane.b32.xlu1 %v1464_v47, %s3725_s22  ;;  %2638 = vrot.lane.b32.xlu2 %v2573_v53, %s3726_s13 }
 0x152   : > { %1572 = vrot.lane.b32.xlu0 %v1027_v55, %s3724_s21  ;;  %v4227_v44 = vpop.f32.mrf.mxu0  ;;  %v1248_v47 = vpop.f32.mrf.mxu2 }
 0x153   : > { %v1551_v57 = vpop.permute.xlu1 %1550  ;;  %v4202_v58 = vpop.permute.xlu2 %1714  ;;  %v2161_v45 = vadd.f32 %v3864_v21, %v4227_v44 }
 0x154   : > { %v1639_v59 = vadd.f32 %v1551_v57, %v4077_v33  ;;  %v4205_v60 = vpop.permute.xlu0 %1710  ;;  %v1469_v54 = vpop.f32.mrf.mxu3 }
 0x155   : > { %5074 = vst [vmem:[#allocation9_spill] sm:$0xff] %v4205_v60  ;;  %vm2193_vm0 = vcmp.gt.f32.partialorder %v2161_v45, 0.0  ;;  %v2225_v53 = vmul.f32 0.01, %v2161_v45 }
 0x156   : > { %v2319_v6 = vadd.f32 %v3981_v24, %v1639_v59 }
 0x157   : > { %v2257_v57 = vsel %vm2193_vm0, %v2161_v45, %v2225_v53 }
 0x158   : > { %vm2351_vm14 = vcmp.gt.f32.partialorder %v2319_v6, 0.0  ;;  %v2383_v14 = vmul.f32 0.01, %v2319_v6  ;;  %2290 = vst.msk [vmem:[%s3954_s28 + $0xc8] sm:$0xff] %vm2276_vm3, %v2257_v57 }
 0x159   : > { %1730 = vrot.lane.b32.xlu1 %v1245_v12, %s3723_s20  ;;  %2050 = vrot.lane.b32.xlu2 %v1466_v13, %s3725_s22 }
 0x15a   : > { %v2415_v17 = vsel %vm2351_vm14, %v2319_v6, %v2383_v14  ;;  %2640 = vrot.lane.b32.xlu0 %v2574_v15, %s3726_s13  ;;  %v1795_v6 = vadd.f32 %v4042_v63, %v3988_v26  ;;  %v4244_v13 = vpop.f32.mrf.mxu0  ;;  %v1029_v15 = vpop.f32.mrf.mxu1 }
 0x15b   : > { %2448 = vst.msk [vmem:[%s3954_s28 + $0x68] sm:$0xff] %vm2440_vm9, %v2415_v17  ;;  %v4219_v23 = vpop.permute.xlu1 %2030  ;;  %v4221_v25 = vpop.permute.xlu2 %1844  ;;  %v2162_v14 = vadd.f32 %v3864_v21, %v4244_v13 }
 0x15c   : > { %5075 = vst [vmem:[#allocation10_spill] sm:$0xff] %v4219_v23  ;;  %v4225_v29 = vpop.permute.xlu0 %1840  ;;  %v2479_v28 = vadd.f32 %v4011_v41, %v1795_v6 }
 0x15d   : > { %5076 = vst [vmem:[#allocation11_spill] sm:$0xff] %v4221_v25  ;;  %vm2194_vm4 = vcmp.gt.f32.partialorder %v2162_v14, 0.0  ;;  %v2226_v45 = vmul.f32 0.01, %v2162_v14 }
 0x15e   : > { %5077 = vst [vmem:[#allocation12_spill] sm:$0xff] %v4225_v29  ;;  %vm2511_vm6 = vcmp.gt.f32.partialorder %v2479_v28, 0.0 }
 0x161   : > { %1860 = vrot.lane.b32.xlu1 %v1027_v55, %s3723_s20  ;;  %1732 = vrot.lane.b32.xlu2 %v1248_v47, %s3723_s20  ;;  %v1250_v47 = vpop.f32.mrf.mxu2 }
 0x162   : > { %2052 = vrot.lane.b32.xlu0 %v1469_v54, %s3725_s22  ;;  %v2258_v54 = vsel %vm2194_vm4, %v2162_v14, %v2226_v45  ;;  %v1032_v14 = vpop.f32.mrf.mxu1 }
 0x163   : > { %v4236_v59 = vpop.permute.xlu1 %1712  ;;  %v1559_v2 = vpop.permute.xlu2 %1558  ;;  %2291 = vst.msk [vmem:[%s3954_s28 + $0xe0] sm:$0xff] %vm2276_vm3, %v2258_v54 }
 0x164   : > { %5078 = vst [vmem:[#allocation13_spill] sm:$0xff] %v4236_v59  ;;  %v1643_v8 = vadd.f32 %v1559_v2, %v4167_v62  ;;  %v1555_v9 = vpop.permute.xlu0 %1554 }
 0x165   : > { %v1641_v12 = vadd.f32 %v1555_v9, %v4131_v22 }
 0x166   : > { %v2323_v55 = vadd.f32 %v3981_v24, %v1643_v8  ;;  %v1796_v8 = vadd.f32 %v4129_v20, %v4008_v39 }
 0x167   : > { %v2321_v17 = vadd.f32 %v3981_v24, %v1641_v12  ;;  %v2543_v12 = vmul.f32 0.01, %v2479_v28 }
 0x168   : > { %vm2355_vm2 = vcmp.gt.f32.partialorder %v2323_v55, 0.0  ;;  %v2387_v43 = vmul.f32 0.01, %v2323_v55 }
 0x169   : > { %vm2353_vm5 = vcmp.gt.f32.partialorder %v2321_v17, 0.0  ;;  %v2385_v50 = vmul.f32 0.01, %v2321_v17  ;;  %1574 = vrot.lane.b32.xlu1 %v1029_v15, %s3724_s21  ;;  %1862 = vrot.lane.b32.xlu2 %v1029_v15, %s3723_s20  ;;  %v2480_v15 = vadd.f32 %v4011_v41, %v1796_v8 }
 0x16a   : > { %v2419_v53 = vsel %vm2355_vm2, %v2323_v55, %v2387_v43  ;;  %1734 = vrot.lane.b32.xlu0 %v1250_v47, %s3723_s20  ;;  %v3617_v55 = vld [vmem:[%s3844_s15 + $0x60] sm:$0xff] }
 0x16b   : > { %2452 = vst.msk [vmem:[%s3954_s28 + $0xa8] sm:$0xff] %vm2440_vm9, %v2419_v53  ;;  %v2417_v57 = vsel %vm2353_vm5, %v2321_v17, %v2385_v50  ;;  %v4256_v2 = vpop.permute.xlu1 %1842  ;;  %v4258_v6 = vpop.permute.xlu2 %2038  ;;  %3290 = vmatmul.msk.bf16.gmra.mxu0 %vm699_vm1, %v3617_v55  ;;  %v2575_v17 = vsel %vm2511_vm6, %v2479_v28, %v2543_v12  ;;  %v2544_v54 = vmul.f32 0.01, %v2480_v15  ;;  %v1797_v28 = vadd.f32 %v4164_v56, %v4025_v49 }
 0x16c   : > { %5079 = vst [vmem:[#allocation14_spill] sm:$0xff] %v4256_v2  ;;  %v4264_v9 = vpop.permute.xlu0 %2034  ;;  %vm2512_vm7 = vcmp.gt.f32.partialorder %v2480_v15, 0.0  ;;  %v1471_v12 = vpop.f32.mrf.mxu3 }
 0x16d   : > { %2450 = vst.msk [vmem:[%s3954_s28 + $0x88] sm:$0xff] %vm2440_vm9, %v2417_v57  ;;  %v4285_v57 = vpop.f32.mrf.mxu0 }
 0x16e   : > { %5080 = vst [vmem:[#allocation15_spill] sm:$0xff] %v4264_v9 }
 0x171   : > { %1576 = vrot.lane.b32.xlu2 %v1032_v14, %s3724_s21  ;;  %2642 = vrot.lane.b32.xlu1 %v2575_v17, %s3726_s13  ;;  %v2481_v17 = vadd.f32 %v4011_v41, %v1797_v28 }
 0x172   : > { %1864 = vrot.lane.b32.xlu0 %v1032_v14, %s3723_s20  ;;  %v2576_v14 = vsel %vm2512_vm7, %v2480_v15, %v2544_v54  ;;  %v2163_v15 = vadd.f32 %v3864_v21, %v4285_v57 }
 0x173   : > { %v1557_v43 = vpop.permute.xlu1 %1556  ;;  %v4274_v45 = vpop.permute.xlu2 %1720  ;;  %vm2513_vm11 = vcmp.gt.f32.partialorder %v2481_v17, 0.0 }
 0x174   : > { %v1642_v47 = vadd.f32 %v1557_v43, %v4148_v37  ;;  %v4279_v50 = vadd.f32 %v4274_v45, %v4207_v3  ;;  %v4281_v53 = vpop.permute.xlu0 %1716  ;;  %v1034_v43 = vpop.f32.mrf.mxu1  ;;  %vm2195_vm10 = vcmp.gt.f32.partialorder %v2163_v15, 0.0 }
 0x175   : > { %v1474_v42 = vpop.f32.mrf.mxu3 }
 0x176   : > { %v2322_v8 = vadd.f32 %v3981_v24, %v1642_v47 }
 0x178   : > { %vm2354_vm8 = vcmp.gt.f32.partialorder %v2322_v8, 0.0  ;;  %v2386_v55 = vmul.f32 0.01, %v2322_v8 }
 0x179   : > { %2054 = vrot.lane.b32.xlu1 %v1471_v12, %s3725_s22  ;;  %2644 = vrot.lane.b32.xlu2 %v2576_v14, %s3726_s13  ;;  %v1253_v12 = vpop.f32.mrf.mxu2  ;;  %v2545_v14 = vmul.f32 0.01, %v2481_v17 }
 0x17a   : > { %v2418_v9 = vsel %vm2354_vm8, %v2322_v8, %v2386_v55  ;;  %1578 = vrot.lane.b32.xlu0 %v1034_v43, %s3724_s21  ;;  %v2227_v8 = vmul.f32 0.01, %v2163_v15  ;;  %v4302_v55 = vpop.f32.mrf.mxu0 }
 0x17b   : > { %2451 = vst.msk [vmem:[%s3954_s28 + $0xa0] sm:$0xff] %vm2440_vm9, %v2418_v9  ;;  %v4294_v2 = vpop.permute.xlu1 %2036  ;;  %v1851_v47 = vpop.permute.xlu2 %1850  ;;  %v3618_v9 = vld [vmem:[%s3844_s15 + $0x68] sm:$0xff] }
 0x17c   : > { %5081 = vst [vmem:[#allocation16_spill] sm:$0xff] %v4294_v2  ;;  %v1847_v54 = vpop.permute.xlu0 %1846  ;;  %v4299_v28 = vadd.f32 %v1851_v47, %v4227_v44  ;;  %v2164_v2 = vadd.f32 %v3864_v21, %v4302_v55  ;;  %v2259_v40 = vsel %vm2195_vm10, %v2163_v15, %v2227_v8  ;;  %3291 = vmatmul.msk.bf16.gmra.mxu0 %vm699_vm1, %v3618_v9  ;;  %v1037_v7 = vpop.f32.mrf.mxu1 }
 0x17d   : > { %v1931_v25 = vadd.f32 %v1847_v54, %v4167_v62  ;;  %2292 = vst.msk [vmem:[%s3954_s28 + $0xe8] sm:$0xff] %vm2276_vm3, %v2259_v40  ;;  %v2577_v54 = vsel %vm2513_vm11, %v2481_v17, %v2545_v14  ;;  %v1476_v14 = vpop.f32.mrf.mxu3 }
 0x17e   : > { %vm2196_vm12 = vcmp.gt.f32.partialorder %v2164_v2, 0.0  ;;  %v2228_v47 = vmul.f32 0.01, %v2164_v2 }
 0x180   : > { %v2260_v23 = vsel %vm2196_vm12, %v2164_v2, %v2228_v47  ;;  %v4329_v2 = vld [vmem:[%s5061_s8] ss:$0 sm:$0xff] }
 0x181   : > { %1736 = vrot.lane.b32.xlu1 %v1253_v12, %s3723_s20  ;;  %2056 = vrot.lane.b32.xlu2 %v1474_v42, %s3725_s22  ;;  %2293 = vst.msk [vmem:[%s3954_s28 + $0x100] sm:$0xff] %vm2276_vm3, %v2260_v23 }
 0x182   : > { %2646 = vrot.lane.b32.xlu0 %v2577_v54, %s3726_s13  ;;  %v4320_v9 = vpop.f32.mrf.mxu0 }
 0x183   : > { %v4313_v32 = vpop.permute.xlu1 %1718  ;;  %v1565_v29 = vpop.permute.xlu2 %1564  ;;  %v2165_v23 = vadd.f32 %v4329_v2, %v4320_v9 }
 0x184   : > { %v1963_v21 = vadd.f32 %v1931_v25, %v4313_v32  ;;  %v1646_v15 = vadd.f32 %v1565_v29, %v4244_v13  ;;  %v1561_v40 = vpop.permute.xlu0 %1560  ;;  %v1255_v25 = vpop.f32.mrf.mxu2 }
 0x185   : > { %v1644_v8 = vadd.f32 %v1561_v40, %v4207_v3  ;;  %vm2197_vm14 = vcmp.gt.f32.partialorder %v2165_v23, 0.0 }
 0x186   : > { %v4323_v42 = vadd.f32 %v4258_v6, %v1963_v21  ;;  %v2326_v17 = vadd.f32 %v3981_v24, %v1646_v15  ;;  %v2229_v6 = vmul.f32 0.01, %v2165_v23 }
 0x187   : > { %v2324_v29 = vadd.f32 %v3981_v24, %v1644_v8 }
 0x188   : > { %5082 = vst [vmem:[#allocation17_spill] sm:$0xff] %v4323_v42  ;;  %vm2358_vm13 = vcmp.gt.f32.partialorder %v2326_v17, 0.0  ;;  %v2390_v12 = vmul.f32 0.01, %v2326_v17  ;;  %v2261_v21 = vsel %vm2197_vm14, %v2165_v23, %v2229_v6  ;;  %v1798_v42 = vadd.f32 %v4127_v19, %v4055_v11 }
 0x189   : > { %vm2356_vm15 = vcmp.gt.f32.partialorder %v2324_v29, 0.0  ;;  %v2388_v47 = vmul.f32 0.01, %v2324_v29  ;;  %1866 = vrot.lane.b32.xlu1 %v1034_v43, %s3723_s20  ;;  %1738 = vrot.lane.b32.xlu2 %v1255_v25, %s3723_s20  ;;  %2294 = vst.msk [vmem:[%s3954_s28 + $0x108] sm:$0xff] %vm2276_vm3, %v2261_v21  ;;  %v1039_v21 = vpop.f32.mrf.mxu1 }
 0x18a   : > { %v2422_v54 = vsel %vm2358_vm13, %v2326_v17, %v2390_v12  ;;  %2058 = vrot.lane.b32.xlu0 %v1476_v14, %s3725_s22  ;;  %v2482_v25 = vadd.f32 %v4011_v41, %v1798_v42 }
 0x18b   : > { %2455 = vst.msk [vmem:[%s3954_s28 + $0xe0] sm:$0xff] %vm2440_vm9, %v2422_v54  ;;  %v2420_v15 = vsel %vm2356_vm15, %v2324_v29, %v2388_v47  ;;  %v1849_v40 = vpop.permute.xlu1 %1848  ;;  %v4339_v8 = vpop.permute.xlu2 %2044 }
 0x18c   : > { %2453 = vst.msk [vmem:[%s3954_s28 + $0xc0] sm:$0xff] %vm2440_vm9, %v2420_v15  ;;  %v1932_v35 = vadd.f32 %v1849_v40, %v4207_v3  ;;  %v2041_v43 = vpop.permute.xlu0 %2040  ;;  %v1258_v29 = vpop.f32.mrf.mxu2  ;;  %v1799_v3 = vadd.f32 %v4205_v60, %v4077_v33  ;;  %v2546_v42 = vmul.f32 0.01, %v2482_v25  ;;  %vm2514_vm0 = vcmp.gt.f32.partialorder %v2482_v25, 0.0 }
 0x18e   : > { %v1964_v17 = vadd.f32 %v1932_v35, %v4274_v45  ;;  %v2483_v15 = vadd.f32 %v4011_v41, %v1799_v3 }
 0x190   : > { %v4349_v23 = vadd.f32 %v2041_v43, %v1964_v17  ;;  %v2578_v43 = vsel %vm2514_vm0, %v2482_v25, %v2546_v42  ;;  %v1800_v25 = vadd.f32 %v4236_v59, %v4096_v52  ;;  %vm2515_vm4 = vcmp.gt.f32.partialorder %v2483_v15, 0.0 }
 0x191   : > { %1580 = vrot.lane.b32.xlu1 %v1037_v7, %s3724_s21  ;;  %1868 = vrot.lane.b32.xlu2 %v1037_v7, %s3723_s20 }
 0x192   : > { %5083 = vst [vmem:[#allocation18_spill] sm:$0xff] %v4349_v23  ;;  %1740 = vrot.lane.b32.xlu0 %v1258_v29, %s3723_s20 }
 0x193   : > { %v1563_v12 = vpop.permute.xlu1 %1562  ;;  %v4355_v6 = vpop.permute.xlu2 %1726 }
 0x194   : > { %v1645_v14 = vadd.f32 %v1563_v12, %v4227_v44  ;;  %v4362_v35 = vadd.f32 %v4355_v6, %v4285_v57  ;;  %v1723_v45 = vpop.permute.xlu0 %1722 }
 0x195   : > { %v4365_v47 = vadd.f32 %v1723_v45, %v4227_v44  ;;  %v1965_v7 = vadd.f32 %v4299_v28, %v1723_v45  ;;  %v1479_v45 = vpop.f32.mrf.mxu3 }
 0x196   : > { %v2325_v54 = vadd.f32 %v3981_v24, %v1645_v14  ;;  %v2547_v14 = vmul.f32 0.01, %v2483_v15 }
 0x198   : > { %vm2357_vm2 = vcmp.gt.f32.partialorder %v2325_v54, 0.0  ;;  %v2389_v40 = vmul.f32 0.01, %v2325_v54 }
 0x199   : > { %1582 = vrot.lane.b32.xlu2 %v1039_v21, %s3724_s21  ;;  %2648 = vrot.lane.b32.xlu1 %v2578_v43, %s3726_s13 }
 0x19a   : > { %v2421_v17 = vsel %vm2357_vm2, %v2325_v54, %v2389_v40  ;;  %1870 = vrot.lane.b32.xlu0 %v1039_v21, %s3723_s20  ;;  %v4383_v54 = vpop.f32.mrf.mxu0  ;;  %v3619_v21 = vld [vmem:[%s3844_s15 + $0x70] sm:$0xff]  ;;  %v2579_v40 = vsel %vm2515_vm4, %v2483_v15, %v2547_v14 }
 0x19b   : > { %2454 = vst.msk [vmem:[%s3954_s28 + $0xc8] sm:$0xff] %vm2440_vm9, %v2421_v17  ;;  %v2043_v44 = vpop.permute.xlu1 %2042  ;;  %v1857_v28 = vpop.permute.xlu2 %1856  ;;  %3292 = vmatmul.msk.bf16.gmra.mxu0 %vm699_vm1, %v3619_v21  ;;  %v2484_v17 = vadd.f32 %v4011_v41, %v1800_v25 }
 0x19c   : > { %v4375_v29 = vadd.f32 %v2043_v44, %v1965_v7  ;;  %v1853_v12 = vpop.permute.xlu0 %1852  ;;  %v4378_v3 = vadd.f32 %v1857_v28, %v4302_v55  ;;  %v2166_v7 = vadd.f32 %v4329_v2, %v4383_v54  ;;  %v1042_v44 = vpop.f32.mrf.mxu1 }
 0x19d   : > { %v1934_v42 = vadd.f32 %v1853_v12, %v4244_v13  ;;  %v2548_v60 = vmul.f32 0.01, %v2484_v17  ;;  %vm2516_vm6 = vcmp.gt.f32.partialorder %v2484_v17, 0.0 }
 0x19e   : > { %5084 = vst [vmem:[#allocation19_spill] sm:$0xff] %v4375_v29  ;;  %vm2198_vm5 = vcmp.gt.f32.partialorder %v2166_v7, 0.0  ;;  %v2230_v43 = vmul.f32 0.01, %v2166_v7 }
 0x1a0   : > { %v2262_v28 = vsel %vm2198_vm5, %v2166_v7, %v2230_v43  ;;  %v1260_v43 = vpop.f32.mrf.mxu2 }
 0x1a1   : > { %2060 = vrot.lane.b32.xlu1 %v1479_v45, %s3725_s22  ;;  %2650 = vrot.lane.b32.xlu2 %v2579_v40, %s3726_s13  ;;  %2295 = vst.msk [vmem:[%s3954_s28 + $0x120] sm:$0xff] %vm2276_vm3, %v2262_v28 }
 0x1a2   : > { %1584 = vrot.lane.b32.xlu0 %v1042_v44, %s3724_s21  ;;  %v4400_v45 = vpop.f32.mrf.mxu0 }
 0x1a3   : > { %v1725_v12 = vpop.permute.xlu1 %1724  ;;  %v1571_v23 = vpop.permute.xlu2 %1570 }
 0x1a4   : > { %v4396_v29 = vadd.f32 %v1725_v12, %v4244_v13  ;;  %v1966_v15 = vadd.f32 %v1934_v42, %v1725_v12  ;;  %v1649_v14 = vadd.f32 %v1571_v23, %v4320_v9  ;;  %v1567_v21 = vpop.permute.xlu0 %1566  ;;  %v2167_v13 = vadd.f32 %v4329_v2, %v4400_v45  ;;  %v1481_v42 = vpop.f32.mrf.mxu3 }
 0x1a5   : > { %v1647_v25 = vadd.f32 %v1567_v21, %v4285_v57 }
 0x1a6   : > { %v4403_v40 = vadd.f32 %v4339_v8, %v1966_v15  ;;  %v2329_v7 = vadd.f32 %v3981_v24, %v1649_v14  ;;  %vm2199_vm8 = vcmp.gt.f32.partialorder %v2167_v13, 0.0  ;;  %v2231_v12 = vmul.f32 0.01, %v2167_v13 }
 0x1a7   : > { %v2327_v23 = vadd.f32 %v3981_v24, %v1647_v25  ;;  %v2580_v15 = vsel %vm2516_vm6, %v2484_v17, %v2548_v60 }
 0x1a8   : > { %5085 = vst [vmem:[#allocation20_spill] sm:$0xff] %v4403_v40  ;;  %vm2361_vm7 = vcmp.gt.f32.partialorder %v2329_v7, 0.0  ;;  %v2393_v28 = vmul.f32 0.01, %v2329_v7  ;;  %v2263_v19 = vsel %vm2199_vm8, %v2167_v13, %v2231_v12 }
 0x1a9   : > { %vm2359_vm10 = vcmp.gt.f32.partialorder %v2327_v23, 0.0  ;;  %v2391_v8 = vmul.f32 0.01, %v2327_v23  ;;  %1742 = vrot.lane.b32.xlu1 %v1260_v43, %s3723_s20  ;;  %2062 = vrot.lane.b32.xlu2 %v1481_v42, %s3725_s22  ;;  %2296 = vst.msk [vmem:[%s3954_s28 + $0x128] sm:$0xff] %vm2276_vm3, %v2263_v19 }
 0x1aa   : > { %v2425_v14 = vsel %vm2361_vm7, %v2329_v7, %v2393_v28  ;;  %2652 = vrot.lane.b32.xlu0 %v2580_v15, %s3726_s13  ;;  %v4419_v43 = vpop.f32.mrf.mxu0  ;;  %v1263_v7 = vpop.f32.mrf.mxu2 }
 0x1ab   : > { %2458 = vst.msk [vmem:[%s3954_s28 + $0x108] sm:$0xff] %vm2440_vm9, %v2425_v14  ;;  %v2423_v21 = vsel %vm2359_vm10, %v2327_v23, %v2391_v8  ;;  %v1855_v25 = vpop.permute.xlu1 %1854  ;;  %v2639_v40 = vpop.permute.xlu2 %2638  ;;  %v2168_v17 = vadd.f32 %v4329_v2, %v4419_v43 }
 0x1ac   : > { %2456 = vst.msk [vmem:[%s3954_s28 + $0xe8] sm:$0xff] %vm2440_vm9, %v2423_v21  ;;  %v1935_v59 = vadd.f32 %v1855_v25, %v4285_v57  ;;  %v2047_v33 = vpop.permute.xlu0 %2046  ;;  %v1484_v23 = vpop.f32.mrf.mxu3 }
 0x1ad   : > { %3535 = vst.msk [vmem:[%s3954_s28 + $0x18] sm:$0xff] %vm2276_vm3, %v2639_v40  ;;  %vm2200_vm11 = vcmp.gt.f32.partialorder %v2168_v17, 0.0  ;;  %v2232_v13 = vmul.f32 0.01, %v2168_v17  ;;  %v1044_v8 = vpop.f32.mrf.mxu1 }
 0x1ae   : > { %v1967_v60 = vadd.f32 %v1935_v59, %v4355_v6 }
 0x1af   : > { %v2264_v57 = vsel %vm2200_vm11, %v2168_v17, %v2232_v13 }
 0x1b0   : > { %v4426_v42 = vadd.f32 %v2047_v33, %v1967_v60  ;;  %2297 = vst.msk [vmem:[%s3954_s28 + $0x140] sm:$0xff] %vm2276_vm3, %v2264_v57  ;;  %v1801_v33 = vadd.f32 %v4202_v58, %v4131_v22  ;;  %v1802_v60 = vadd.f32 %v4281_v53, %v4148_v37 }
 0x1b1   : > { %1872 = vrot.lane.b32.xlu1 %v1042_v44, %s3723_s20  ;;  %1744 = vrot.lane.b32.xlu2 %v1263_v7, %s3723_s20 }
 0x1b2   : > { %5086 = vst [vmem:[#allocation21_spill] sm:$0xff] %v4426_v42  ;;  %2064 = vrot.lane.b32.xlu0 %v1484_v23, %s3725_s22  ;;  %v2485_v14 = vadd.f32 %v4011_v41, %v1801_v33  ;;  %v1265_v21 = vpop.f32.mrf.mxu2  ;;  %v3620_v23 = vld [vmem:[%s3844_s15 + $0x78] sm:$0xff] }
 0x1b3   : > { %v1569_v40 = vpop.permute.xlu1 %1568  ;;  %v4431_v59 = vpop.permute.xlu2 %2050  ;;  %3293 = vmatmul.msk.bf16.gmra.mxu0 %vm699_vm1, %v3620_v23 }
 0x1b4   : > { %v1648_v19 = vadd.f32 %v1569_v40, %v4302_v55  ;;  %v1729_v6 = vpop.permute.xlu0 %1728  ;;  %v2549_v13 = vmul.f32 0.01, %v2485_v14  ;;  %vm2517_vm13 = vcmp.gt.f32.partialorder %v2485_v14, 0.0  ;;  %v2486_v40 = vadd.f32 %v4011_v41, %v1802_v60 }
 0x1b5   : > { %v4439_v28 = vadd.f32 %v1729_v6, %v4302_v55  ;;  %v1968_v44 = vadd.f32 %v4378_v3, %v1729_v6  ;;  %v1047_v57 = vpop.f32.mrf.mxu1 }
 0x1b6   : > { %v2328_v12 = vadd.f32 %v3981_v24, %v1648_v19  ;;  %v2581_v33 = vsel %vm2517_vm13, %v2485_v14, %v2549_v13  ;;  %vm2518_vm1 = vcmp.gt.f32.partialorder %v2486_v40, 0.0  ;;  %v1486_v13 = vpop.f32.mrf.mxu3 }
 0x1b8   : > { %vm2360_vm12 = vcmp.gt.f32.partialorder %v2328_v12, 0.0  ;;  %v2392_v15 = vmul.f32 0.01, %v2328_v12 }
 0x1b9   : > { %1586 = vrot.lane.b32.xlu1 %v1044_v8, %s3724_s21  ;;  %1874 = vrot.lane.b32.xlu2 %v1044_v8, %s3723_s20 }
 0x1ba   : > { %v2424_v25 = vsel %vm2360_vm12, %v2328_v12, %v2392_v15  ;;  %1746 = vrot.lane.b32.xlu0 %v1265_v21, %s3723_s20  ;;  %v2550_v15 = vmul.f32 0.01, %v2486_v40  ;;  %v1268_v42 = vpop.f32.mrf.mxu2 }
 0x1bb   : > { %2457 = vst.msk [vmem:[%s3954_s28 + $0x100] sm:$0xff] %vm2440_vm9, %v2424_v25  ;;  %v2637_v55 = vpop.permute.xlu1 %2636  ;;  %v4449_v3 = vpop.permute.xlu2 %1732  ;;  %v1803_v25 = vadd.f32 %v4313_v32, %v4167_v62 }
 0x1bc   : > { %3534 = vst.msk [vmem:[%s3954_s28 + $0x10] sm:$0xff] %vm2276_vm3, %v2637_v55  ;;  %v4457_v17 = vadd.f32 %v4449_v3, %v4383_v54  ;;  %v1859_v7 = vpop.permute.xlu0 %1858  ;;  %v4473_v55 = vpop.f32.mrf.mxu0  ;;  %v2582_v23 = vsel %vm2518_vm1, %v2486_v40, %v2550_v15 }
 0x1bd   : > { %v2169_v60 = vadd.f32 %v4329_v2, %v4473_v55  ;;  %v1937_v62 = vadd.f32 %v1859_v7, %v4320_v9 }
 0x1bf   : > { %vm2201_vm14 = vcmp.gt.f32.partialorder %v2169_v60, 0.0 }
 0x1c1   : > { %1588 = vrot.lane.b32.xlu2 %v1047_v57, %s3724_s21  ;;  %2654 = vrot.lane.b32.xlu1 %v2581_v33, %s3726_s13  ;;  %v2487_v33 = vadd.f32 %v4011_v41, %v1803_v25 }
 0x1c2   : > { %1876 = vrot.lane.b32.xlu0 %v1047_v57, %s3723_s20  ;;  %v2233_v57 = vmul.f32 0.01, %v2169_v60 }
 0x1c3   : > { %v2049_v19 = vpop.permute.xlu1 %2048  ;;  %v1863_v6 = vpop.permute.xlu2 %1862  ;;  %v2551_v7 = vmul.f32 0.01, %v2487_v33  ;;  %vm2519_vm0 = vcmp.gt.f32.partialorder %v2487_v33, 0.0 }
 0x1c4   : > { %v4465_v12 = vadd.f32 %v2049_v19, %v1968_v44  ;;  %v1573_v8 = vpop.permute.xlu0 %1572  ;;  %v4468_v21 = vadd.f32 %v1863_v6, %v4400_v45  ;;  %v1049_v19 = vpop.f32.mrf.mxu1  ;;  %v2265_v6 = vsel %vm2201_vm14, %v2169_v60, %v2233_v57 }
 0x1c5   : > { %v1650_v14 = vadd.f32 %v1573_v8, %v4383_v54  ;;  %2298 = vst.msk [vmem:[%s3954_s28 + $0x148] sm:$0xff] %vm2276_vm3, %v2265_v6 }
 0x1c6   : > { %5087 = vst [vmem:[#allocation22_spill] sm:$0xff] %v4465_v12 }
 0x1c7   : > { %v2330_v44 = vadd.f32 %v3981_v24, %v1650_v14 }
 0x1c9   : > { %vm2362_vm15 = vcmp.gt.f32.partialorder %v2330_v44, 0.0  ;;  %v2394_v32 = vmul.f32 0.01, %v2330_v44  ;;  %2066 = vrot.lane.b32.xlu1 %v1486_v13, %s3725_s22  ;;  %2656 = vrot.lane.b32.xlu2 %v2582_v23, %s3726_s13  ;;  %v4493_v23 = vpop.f32.mrf.mxu0 }
 0x1ca   : > { %1590 = vrot.lane.b32.xlu0 %v1049_v19, %s3724_s21  ;;  %v2170_v57 = vadd.f32 %v4329_v2, %v4493_v23 }
 0x1cb   : > { %v2426_v8 = vsel %vm2362_vm15, %v2330_v44, %v2394_v32  ;;  %v4483_v40 = vpop.permute.xlu1 %1730  ;;  %v1577_v15 = vpop.permute.xlu2 %1576 }
 0x1cc   : > { %2459 = vst.msk [vmem:[%s3954_s28 + $0x120] sm:$0xff] %vm2440_vm9, %v2426_v8  ;;  %v1969_v25 = vadd.f32 %v1937_v62, %v4483_v40  ;;  %v1652_v14 = vadd.f32 %v1577_v15, %v4419_v43  ;;  %v2641_v13 = vpop.permute.xlu0 %2640  ;;  %v1489_v32 = vpop.f32.mrf.mxu3  ;;  %vm2202_vm4 = vcmp.gt.f32.partialorder %v2170_v57, 0.0  ;;  %v2234_v6 = vmul.f32 0.01, %v2170_v57 }
 0x1cd   : > { %3536 = vst.msk [vmem:[%s3954_s28 + $0x30] sm:$0xff] %vm2276_vm3, %v2641_v13  ;;  %v2583_v8 = vsel %vm2519_vm0, %v2487_v33, %v2551_v7 }
 0x1ce   : > { %v4496_v60 = vadd.f32 %v4431_v59, %v1969_v25  ;;  %v2332_v44 = vadd.f32 %v3981_v24, %v1652_v14  ;;  %v2266_v15 = vsel %vm2202_vm4, %v2170_v57, %v2234_v6 }
 0x1cf   : > { %2299 = vst.msk [vmem:[%s3954_s28 + $0x160] sm:$0xff] %vm2276_vm3, %v2266_v15 }
 0x1d0   : > { %5088 = vst [vmem:[#allocation23_spill] sm:$0xff] %v4496_v60  ;;  %vm2364_vm2 = vcmp.gt.f32.partialorder %v2332_v44, 0.0  ;;  %v2396_v62 = vmul.f32 0.01, %v2332_v44 }
 0x1d1   : > { %1748 = vrot.lane.b32.xlu1 %v1268_v42, %s3723_s20  ;;  %2068 = vrot.lane.b32.xlu2 %v1489_v32, %s3725_s22  ;;  %v4511_v42 = vpop.f32.mrf.mxu0 }
 0x1d2   : > { %v2428_v59 = vsel %vm2364_vm2, %v2332_v44, %v2396_v62  ;;  %2658 = vrot.lane.b32.xlu0 %v2583_v8, %s3726_s13  ;;  %v2171_v7 = vadd.f32 %v4329_v2, %v4511_v42  ;;  %v1270_v44 = vpop.f32.mrf.mxu2 }
 0x1d3   : > { %2461 = vst.msk [vmem:[%s3954_s28 + $0x140] sm:$0xff] %vm2440_vm9, %v2428_v59  ;;  %v1861_v25 = vpop.permute.xlu1 %1860  ;;  %v2645_v14 = vpop.permute.xlu2 %2644 }
 0x1d4   : > { %v1938_v13 = vadd.f32 %v1861_v25, %v4383_v54  ;;  %3538 = vst.msk [vmem:[%s3954_s28 + $0x50] sm:$0xff] %vm2276_vm3, %v2645_v14  ;;  %v2053_v60 = vpop.permute.xlu0 %2052  ;;  %vm2203_vm5 = vcmp.gt.f32.partialorder %v2171_v7, 0.0  ;;  %v2235_v32 = vmul.f32 0.01, %v2171_v7  ;;  %v1491_v62 = vpop.f32.mrf.mxu3 }
 0x1d5   : > { %v1052_v59 = vpop.f32.mrf.mxu1 }
 0x1d6   : > { %v1970_v33 = vadd.f32 %v1938_v13, %v4449_v3  ;;  %v2267_v54 = vsel %vm2203_vm5, %v2171_v7, %v2235_v32  ;;  %v2488_v13 = vadd.f32 %v4011_v41, %v4279_v50 }
 0x1d7   : > { %2300 = vst.msk [vmem:[%s3954_s28 + $0x168] sm:$0xff] %vm2276_vm3, %v2267_v54  ;;  %v2489_v54 = vadd.f32 %v4011_v41, %v4365_v47 }
 0x1d8   : > { %v4516_v57 = vadd.f32 %v2053_v60, %v1970_v33  ;;  %v2552_v32 = vmul.f32 0.01, %v2488_v13  ;;  %vm2520_vm7 = vcmp.gt.f32.partialorder %v2488_v13, 0.0 }
 0x1d9   : > { %1878 = vrot.lane.b32.xlu1 %v1049_v19, %s3723_s20  ;;  %1750 = vrot.lane.b32.xlu2 %v1270_v44, %s3723_s20  ;;  %vm2521_vm8 = vcmp.gt.f32.partialorder %v2489_v54, 0.0 }
 0x1da   : > { %5089 = vst [vmem:[#allocation24_spill] sm:$0xff] %v4516_v57  ;;  %2070 = vrot.lane.b32.xlu0 %v1491_v62, %s3725_s22  ;;  %v1273_v33 = vpop.f32.mrf.mxu2 }
 0x1db   : > { %v1575_v6 = vpop.permute.xlu1 %1574  ;;  %v4521_v8 = vpop.permute.xlu2 %2056 }
 0x1dc   : > { %v1651_v3 = vadd.f32 %v1575_v6, %v4400_v45  ;;  %v1735_v60 = vpop.permute.xlu0 %1734  ;;  %v2584_v6 = vsel %vm2520_vm7, %v2488_v13, %v2552_v32 }
 0x1dd   : > { %v4527_v15 = vadd.f32 %v1735_v60, %v4400_v45  ;;  %v1971_v19 = vadd.f32 %v4468_v21, %v1735_v60  ;;  %v1054_v62 = vpop.f32.mrf.mxu1 }
 0x1de   : > { %v2331_v25 = vadd.f32 %v3981_v24, %v1651_v3 }
 0x1e0   : > { %vm2363_vm6 = vcmp.gt.f32.partialorder %v2331_v25, 0.0  ;;  %v2395_v14 = vmul.f32 0.01, %v2331_v25 }
 0x1e1   : > { %1592 = vrot.lane.b32.xlu1 %v1052_v59, %s3724_s21  ;;  %1880 = vrot.lane.b32.xlu2 %v1052_v59, %s3723_s20 }
 0x1e2   : > { %v2427_v7 = vsel %vm2363_vm6, %v2331_v25, %v2395_v14  ;;  %1752 = vrot.lane.b32.xlu0 %v1273_v33, %s3723_s20  ;;  %v2553_v14 = vmul.f32 0.01, %v2489_v54 }
 0x1e3   : > { %2460 = vst.msk [vmem:[%s3954_s28 + $0x128] sm:$0xff] %vm2440_vm9, %v2427_v7  ;;  %v2643_v45 = vpop.permute.xlu1 %2642  ;;  %v4538_v44 = vpop.permute.xlu2 %1738 }
 0x1e4   : > { %3537 = vst.msk [vmem:[%s3954_s28 + $0x38] sm:$0xff] %vm2276_vm3, %v2643_v45  ;;  %v4544_v21 = vadd.f32 %v4538_v44, %v4473_v55  ;;  %v1865_v50 = vpop.permute.xlu0 %1864  ;;  %v1494_v45 = vpop.f32.mrf.mxu3 }
 0x1e5   : > { %v1940_v57 = vadd.f32 %v1865_v50, %v4419_v43 }
 0x1e8   : > { %v4556_v7 = vpop.f32.mrf.mxu0 }
 0x1e9   : > { %1594 = vrot.lane.b32.xlu2 %v1054_v62, %s3724_s21  ;;  %2660 = vrot.lane.b32.xlu1 %v2584_v6, %s3726_s13  ;;  %v2172_v13 = vadd.f32 %v4329_v2, %v4556_v7  ;;  %v2490_v6 = vadd.f32 %v4011_v41, %v4396_v29 }
 0x1ea   : > { %1882 = vrot.lane.b32.xlu0 %v1054_v62, %s3723_s20  ;;  %v2585_v62 = vsel %vm2521_vm8, %v2489_v54, %v2553_v14 }
 0x1eb   : > { %v2055_v3 = vpop.permute.xlu1 %2054  ;;  %v1869_v60 = vpop.permute.xlu2 %1868  ;;  %vm2204_vm10 = vcmp.gt.f32.partialorder %v2172_v13, 0.0  ;;  %v2554_v50 = vmul.f32 0.01, %v2490_v6  ;;  %vm2522_vm12 = vcmp.gt.f32.partialorder %v2490_v6, 0.0 }
 0x1ec   : > { %v4551_v59 = vadd.f32 %v2055_v3, %v1971_v19  ;;  %v1579_v25 = vpop.permute.xlu0 %1578  ;;  %v4554_v33 = vadd.f32 %v1869_v60, %v4493_v23  ;;  %v2236_v19 = vmul.f32 0.01, %v2172_v13  ;;  %v1057_v3 = vpop.f32.mrf.mxu1 }
 0x1ed   : > { %v1653_v47 = vadd.f32 %v1579_v25, %v4473_v55 }
 0x1ee   : > { %5090 = vst [vmem:[#allocation25_spill] sm:$0xff] %v4551_v59  ;;  %v2268_v25 = vsel %vm2204_vm10, %v2172_v13, %v2236_v19 }
 0x1ef   : > { %v2333_v32 = vadd.f32 %v3981_v24, %v1653_v47  ;;  %2301 = vst.msk [vmem:[%s3954_s28 + $0x180] sm:$0xff] %vm2276_vm3, %v2268_v25 }
 0x1f0   : > { %v4576_v12 = vpop.f32.mrf.mxu0 }
 0x1f1   : > { %vm2365_vm11 = vcmp.gt.f32.partialorder %v2333_v32, 0.0  ;;  %v2397_v60 = vmul.f32 0.01, %v2333_v32  ;;  %2072 = vrot.lane.b32.xlu1 %v1494_v45, %s3725_s22  ;;  %2662 = vrot.lane.b32.xlu2 %v2585_v62, %s3726_s13  ;;  %v2173_v13 = vadd.f32 %v4329_v2, %v4576_v12  ;;  %v1496_v62 = vpop.f32.mrf.mxu3 }
 0x1f2   : > { %1596 = vrot.lane.b32.xlu0 %v1057_v3, %s3724_s21 }
 0x1f3   : > { %v2429_v47 = vsel %vm2365_vm11, %v2333_v32, %v2397_v60  ;;  %v4570_v54 = vpop.permute.xlu1 %1736  ;;  %v1583_v14 = vpop.permute.xlu2 %1582  ;;  %vm2205_vm13 = vcmp.gt.f32.partialorder %v2173_v13, 0.0  ;;  %v2237_v60 = vmul.f32 0.01, %v2173_v13 }
 0x1f4   : > { %2462 = vst.msk [vmem:[%s3954_s28 + $0x148] sm:$0xff] %vm2440_vm9, %v2429_v47  ;;  %v1972_v29 = vadd.f32 %v1940_v57, %v4570_v54  ;;  %v1655_v59 = vadd.f32 %v1583_v14, %v4511_v42  ;;  %v2647_v45 = vpop.permute.xlu0 %2646  ;;  %v1275_v57 = vpop.f32.mrf.mxu2  ;;  %v2586_v47 = vsel %vm2522_vm12, %v2490_v6, %v2554_v50 }
 0x1f5   : > { %3539 = vst.msk [vmem:[%s3954_s28 + $0x58] sm:$0xff] %vm2276_vm3, %v2647_v45  ;;  %v2269_v14 = vsel %vm2205_vm13, %v2173_v13, %v2237_v60 }
 0x1f6   : > { %v4583_v32 = vadd.f32 %v4521_v8, %v1972_v29  ;;  %v2335_v19 = vadd.f32 %v3981_v24, %v1655_v59  ;;  %2302 = vst.msk [vmem:[%s3954_s28 + $0x188] sm:$0xff] %vm2276_vm3, %v2269_v14 }
 0x1f8   : > { %5091 = vst [vmem:[#allocation26_spill] sm:$0xff] %v4583_v32  ;;  %vm2367_vm1 = vcmp.gt.f32.partialorder %v2335_v19, 0.0  ;;  %v2399_v25 = vmul.f32 0.01, %v2335_v19 }
 0x1f9   : > { %1754 = vrot.lane.b32.xlu1 %v1275_v57, %s3723_s20  ;;  %2074 = vrot.lane.b32.xlu2 %v1496_v62, %s3725_s22  ;;  %v4596_v57 = vpop.f32.mrf.mxu0  ;;  %v1499_v60 = vpop.f32.mrf.mxu3 }
 0x1fa   : > { %v2431_v45 = vsel %vm2367_vm1, %v2335_v19, %v2399_v25  ;;  %2664 = vrot.lane.b32.xlu0 %v2586_v47, %s3726_s13  ;;  %v2174_v50 = vadd.f32 %v4329_v2, %v4596_v57 }
 0x1fb   : > { %2464 = vst.msk [vmem:[%s3954_s28 + $0x168] sm:$0xff] %vm2440_vm9, %v2431_v45  ;;  %v1867_v8 = vpop.permute.xlu1 %1866  ;;  %v2651_v59 = vpop.permute.xlu2 %2650 }
 0x1fc   : > { %v1941_v29 = vadd.f32 %v1867_v8, %v4473_v55  ;;  %3541 = vst.msk [vmem:[%s3954_s28 + $0x78] sm:$0xff] %vm2276_vm3, %v2651_v59  ;;  %v2059_v32 = vpop.permute.xlu0 %2058  ;;  %v1278_v13 = vpop.f32.mrf.mxu2  ;;  %vm2206_vm14 = vcmp.gt.f32.partialorder %v2174_v50, 0.0  ;;  %v2238_v62 = vmul.f32 0.01, %v2174_v50  ;;  %v2492_v59 = vadd.f32 %v4011_v41, %v4439_v28 }
 0x1fe   : > { %v1973_v6 = vadd.f32 %v1941_v29, %v4538_v44  ;;  %v2270_v55 = vsel %vm2206_vm14, %v2174_v50, %v2238_v62  ;;  %v1059_v29 = vpop.f32.mrf.mxu1  ;;  %v2491_v50 = vadd.f32 %v4011_v41, %v4362_v35  ;;  %vm2524_vm2 = vcmp.gt.f32.partialorder %v2492_v59, 0.0 }
 0x1ff   : > { %2303 = vst.msk [vmem:[%s3954_s28 + $0x1a0] sm:$0xff] %vm2276_vm3, %v2270_v55 }
 0x200   : > { %v4601_v19 = vadd.f32 %v2059_v32, %v1973_v6  ;;  %v1809_v32 = vadd.f32 %v4483_v40, %v4320_v9  ;;  %v2555_v62 = vmul.f32 0.01, %v2491_v50  ;;  %vm2523_vm0 = vcmp.gt.f32.partialorder %v2491_v50, 0.0 }
 0x201   : > { %1884 = vrot.lane.b32.xlu1 %v1057_v3, %s3723_s20  ;;  %1756 = vrot.lane.b32.xlu2 %v1278_v13, %s3723_s20 }
 0x202   : > { %5092 = vst [vmem:[#allocation27_spill] sm:$0xff] %v4601_v19  ;;  %2076 = vrot.lane.b32.xlu0 %v1499_v60, %s3725_s22  ;;  %v2493_v13 = vadd.f32 %v4011_v41, %v1809_v32  ;;  %v2556_v60 = vmul.f32 0.01, %v2492_v59 }
 0x203   : > { %v1581_v25 = vpop.permute.xlu1 %1580  ;;  %v4606_v47 = vpop.permute.xlu2 %2062 }
 0x204   : > { %v1654_v44 = vadd.f32 %v1581_v25, %v4493_v23  ;;  %v1741_v14 = vpop.permute.xlu0 %1740  ;;  %v1280_v9 = vpop.f32.mrf.mxu2  ;;  %v2557_v55 = vmul.f32 0.01, %v2493_v13  ;;  %vm2525_vm4 = vcmp.gt.f32.partialorder %v2493_v13, 0.0  ;;  %v2587_v25 = vsel %vm2523_vm0, %v2491_v50, %v2555_v62 }
 0x205   : > { %v4614_v45 = vadd.f32 %v1741_v14, %v4493_v23  ;;  %v1974_v3 = vadd.f32 %v4554_v33, %v1741_v14  ;;  %v1501_v62 = vpop.f32.mrf.mxu3 }
 0x206   : > { %v2334_v8 = vadd.f32 %v3981_v24, %v1654_v44  ;;  %v2588_v44 = vsel %vm2524_vm2, %v2492_v59, %v2556_v60  ;;  %v2589_v14 = vsel %vm2525_vm4, %v2493_v13, %v2557_v55 }
 0x208   : > { %vm2366_vm15 = vcmp.gt.f32.partialorder %v2334_v8, 0.0  ;;  %v2398_v6 = vmul.f32 0.01, %v2334_v8 }
 0x209   : > { %1598 = vrot.lane.b32.xlu1 %v1059_v29, %s3724_s21  ;;  %1886 = vrot.lane.b32.xlu2 %v1059_v29, %s3723_s20 }
 0x20a   : > { %v2430_v40 = vsel %vm2366_vm15, %v2334_v8, %v2398_v6  ;;  %1758 = vrot.lane.b32.xlu0 %v1280_v9, %s3723_s20 }
 0x20b   : > { %2463 = vst.msk [vmem:[%s3954_s28 + $0x160] sm:$0xff] %vm2440_vm9, %v2430_v40  ;;  %v2649_v23 = vpop.permute.xlu1 %2648  ;;  %v1745_v28 = vpop.permute.xlu2 %1744 }
 0x20c   : > { %3540 = vst.msk [vmem:[%s3954_s28 + $0x70] sm:$0xff] %vm2276_vm3, %v2649_v23  ;;  %v4631_v33 = vadd.f32 %v1745_v28, %v4556_v7  ;;  %v1871_v35 = vpop.permute.xlu0 %1870  ;;  %v4639_v40 = vpop.f32.mrf.mxu0 }
 0x20d   : > { %v2175_v59 = vadd.f32 %v4329_v2, %v4639_v40  ;;  %v1943_v55 = vadd.f32 %v1871_v35, %v4511_v42 }
 0x20f   : > { %vm2207_vm5 = vcmp.gt.f32.partialorder %v2175_v59, 0.0  ;;  %v2239_v23 = vmul.f32 0.01, %v2175_v59 }
 0x211   : > { %2666 = vrot.lane.b32.xlu1 %v2587_v25, %s3726_s13  ;;  %2668 = vrot.lane.b32.xlu2 %v2588_v44, %s3726_s13  ;;  %v2271_v60 = vsel %vm2207_vm5, %v2175_v59, %v2239_v23 }
 0x212   : > { %2670 = vrot.lane.b32.xlu0 %v2589_v14, %s3726_s13  ;;  %2304 = vst.msk [vmem:[%s3954_s28 + $0x1a8] sm:$0xff] %vm2276_vm3, %v2271_v60 }
 0x213   : > { %v2061_v32 = vpop.permute.xlu1 %2060  ;;  %v1875_v8 = vpop.permute.xlu2 %1874 }
 0x214   : > { %v4636_v29 = vadd.f32 %v2061_v32, %v1974_v3  ;;  %v1585_v6 = vpop.permute.xlu0 %1584  ;;  %v1945_v9 = vadd.f32 %v1875_v8, %v4576_v12 }
 0x215   : > { %v1656_v50 = vadd.f32 %v1585_v6, %v4556_v7 }
 0x216   : > { %5093 = vst [vmem:[#allocation28_spill] sm:$0xff] %v4636_v29 }
 0x217   : > { %v2336_v13 = vadd.f32 %v3981_v24, %v1656_v50 }
 0x218   : > { %v4657_v50 = vpop.f32.mrf.mxu0 }
 0x219   : > { %vm2368_vm6 = vcmp.gt.f32.partialorder %v2336_v13, 0.0  ;;  %v2400_v3 = vmul.f32 0.01, %v2336_v13  ;;  %2078 = vrot.lane.b32.xlu1 %v1501_v62, %s3725_s22  ;;  %v2176_v35 = vadd.f32 %v4329_v2, %v4657_v50 }
 0x21a   : > { %2765 = vrot.lane.b32.xlu0 %v4329_v2, %s3725_s22 }
 0x21b   : > { %v2432_v25 = vsel %vm2368_vm6, %v2336_v13, %v2400_v3  ;;  %v4651_v44 = vpop.permute.xlu1 %1742  ;;  %v1589_v14 = vpop.permute.xlu2 %1588  ;;  %vm2208_vm7 = vcmp.gt.f32.partialorder %v2176_v35, 0.0  ;;  %v2240_v23 = vmul.f32 0.01, %v2176_v35 }
 0x21c   : > { %2465 = vst.msk [vmem:[%s3954_s28 + $0x180] sm:$0xff] %vm2440_vm9, %v2432_v25  ;;  %v1975_v32 = vadd.f32 %v1943_v55, %v4651_v44  ;;  %v1658_v8 = vadd.f32 %v1589_v14, %v4596_v57  ;;  %v2653_v6 = vpop.permute.xlu0 %2652 }
 0x21d   : > { %3542 = vst.msk [vmem:[%s3954_s28 + $0x90] sm:$0xff] %vm2276_vm3, %v2653_v6  ;;  %v2272_v3 = vsel %vm2208_vm7, %v2176_v35, %v2240_v23 }
 0x21e   : > { %v4664_v59 = vadd.f32 %v4606_v47, %v1975_v32  ;;  %v2338_v13 = vadd.f32 %v3981_v24, %v1658_v8  ;;  %2305 = vst.msk [vmem:[%s3954_s28 + $0x1c0] sm:$0xff] %vm2276_vm3, %v2272_v3 }
 0x220   : > { %5094 = vst [vmem:[#allocation29_spill] sm:$0xff] %v4664_v59  ;;  %vm2370_vm8 = vcmp.gt.f32.partialorder %v2338_v13, 0.0  ;;  %v2402_v62 = vmul.f32 0.01, %v2338_v13  ;;  %v4674_v32 = vpop.f32.mrf.mxu0 }
 0x221   : > { %v2177_v6 = vadd.f32 %v4329_v2, %v4674_v32 }
 0x222   : > { %v2434_v60 = vsel %vm2370_vm8, %v2338_v13, %v2402_v62 }
 0x223   : > { %2467 = vst.msk [vmem:[%s3954_s28 + $0x1a0] sm:$0xff] %vm2440_vm9, %v2434_v60  ;;  %v1873_v55 = vpop.permute.xlu1 %1872  ;;  %v2657_v25 = vpop.permute.xlu2 %2656  ;;  %vm2209_vm10 = vcmp.gt.f32.partialorder %v2177_v6, 0.0  ;;  %v2241_v13 = vmul.f32 0.01, %v2177_v6 }
 0x224   : > { %v1944_v14 = vadd.f32 %v1873_v55, %v4556_v7  ;;  %3544 = vst.msk [vmem:[%s3954_s28 + $0xb0] sm:$0xff] %vm2276_vm3, %v2657_v25  ;;  %v2065_v47 = vpop.permute.xlu0 %2064 }
 0x225   : > { %v2273_v23 = vsel %vm2209_vm10, %v2177_v6, %v2241_v13 }
 0x226   : > { %v1976_v8 = vadd.f32 %v1944_v14, %v1745_v28  ;;  %2306 = vst.msk [vmem:[%s3954_s28 + $0x1c8] sm:$0xff] %vm2276_vm3, %v2273_v23 }
 0x228   : > { %v4678_v35 = vadd.f32 %v2065_v47, %v1976_v8 }
 0x22a   : > { %5095 = vst [vmem:[#allocation30_spill] sm:$0xff] %v4678_v35 }
 0x22b   : > { %v1587_v62 = vpop.permute.xlu1 %1586  ;;  %v2069_v3 = vpop.permute.xlu2 %2068 }
 0x22c   : > { %v1657_v7 = vadd.f32 %v1587_v62, %v4576_v12  ;;  %v1747_v60 = vpop.permute.xlu0 %1746 }
 0x22d   : > { %v4684_v55 = vadd.f32 %v1747_v60, %v4576_v12  ;;  %v1977_v28 = vadd.f32 %v1945_v9, %v1747_v60 }
 0x22e   : > { %v2337_v25 = vadd.f32 %v3981_v24, %v1657_v7 }
 0x230   : > { %vm2369_vm11 = vcmp.gt.f32.partialorder %v2337_v25, 0.0  ;;  %v2401_v14 = vmul.f32 0.01, %v2337_v25  ;;  %v4697_v60 = vpop.f32.mrf.mxu0 }
 0x232   : > { %v2433_v47 = vsel %vm2369_vm11, %v2337_v25, %v2401_v14  ;;  %v2178_v14 = vadd.f32 %v4329_v2, %v4697_v60 }
 0x233   : > { %2466 = vst.msk [vmem:[%s3954_s28 + $0x188] sm:$0xff] %vm2440_vm9, %v2433_v47  ;;  %v2655_v8 = vpop.permute.xlu1 %2654  ;;  %v1751_v6 = vpop.permute.xlu2 %1750 }
 0x234   : > { %3543 = vst.msk [vmem:[%s3954_s28 + $0x98] sm:$0xff] %vm2276_vm3, %v2655_v8  ;;  %v4692_v13 = vadd.f32 %v1751_v6, %v4639_v40  ;;  %v1877_v23 = vpop.permute.xlu0 %1876  ;;  %vm2210_vm12 = vcmp.gt.f32.partialorder %v2178_v14, 0.0  ;;  %v2242_v8 = vmul.f32 0.01, %v2178_v14 }
 0x236   : > { %5096 = vst [vmem:[#allocation31_spill] sm:$0xff] %v4692_v13 }
 0x238   : > { %v4712_v29 = vpop.f32.mrf.mxu0 }
 0x23b   : > { %v2067_v62 = vpop.permute.xlu1 %2066  ;;  %v1881_v12 = vpop.permute.xlu2 %1880 }
 0x23c   : > { %v4694_v35 = vadd.f32 %v2067_v62, %v1977_v28  ;;  %v1591_v9 = vpop.permute.xlu0 %1590  ;;  %v1948_v7 = vadd.f32 %v1881_v12, %v4657_v50  ;;  %v2274_v28 = vsel %vm2210_vm12, %v2178_v14, %v2242_v8  ;;  %v1946_v62 = vadd.f32 %v1877_v23, %v4596_v57 }
 0x23d   : > { %v1659_v25 = vadd.f32 %v1591_v9, %v4639_v40  ;;  %2307 = vst.msk [vmem:[%s3954_s28 + $0x1e0] sm:$0xff] %vm2276_vm3, %v2274_v28 }
 0x23e   : > { %5097 = vst [vmem:[#allocation32_spill] sm:$0xff] %v4694_v35 }
 0x23f   : > { %v2339_v47 = vadd.f32 %v3981_v24, %v1659_v25 }
 0x241   : > { %vm2371_vm13 = vcmp.gt.f32.partialorder %v2339_v47, 0.0  ;;  %v2403_v19 = vmul.f32 0.01, %v2339_v47 }
 0x243   : > { %v2435_v12 = vsel %vm2371_vm13, %v2339_v47, %v2403_v19  ;;  %v4706_v35 = vpop.permute.xlu1 %1748  ;;  %v1595_v59 = vpop.permute.xlu2 %1594  ;;  %v2179_v19 = vadd.f32 %v4329_v2, %v4712_v29 }
 0x244   : > { %2468 = vst.msk [vmem:[%s3954_s28 + $0x1a8] sm:$0xff] %vm2440_vm9, %v2435_v12  ;;  %v1978_v9 = vadd.f32 %v1946_v62, %v4706_v35  ;;  %v1661_v25 = vadd.f32 %v1595_v59, %v4674_v32  ;;  %v2659_v13 = vpop.permute.xlu0 %2658 }
 0x245   : > { %3545 = vst.msk [vmem:[%s3954_s28 + $0xb8] sm:$0xff] %vm2276_vm3, %v2659_v13  ;;  %vm2211_vm1 = vcmp.gt.f32.partialorder %v2179_v19, 0.0  ;;  %v2243_v47 = vmul.f32 0.01, %v2179_v19 }
 0x246   : > { %v4718_v23 = vadd.f32 %v2069_v3, %v1978_v9  ;;  %v2341_v14 = vadd.f32 %v3981_v24, %v1661_v25 }
 0x247   : > { %v2275_v28 = vsel %vm2211_vm1, %v2179_v19, %v2243_v47 }
 0x248   : > { %5098 = vst [vmem:[#allocation33_spill] sm:$0xff] %v4718_v23  ;;  %vm2373_vm14 = vcmp.gt.f32.partialorder %v2341_v14, 0.0  ;;  %v2405_v8 = vmul.f32 0.01, %v2341_v14 }
 0x249   : > { %2308 = vst.msk [vmem:[%s3954_s28 + $0x1e8] sm:$0xff] %vm2276_vm3, %v2275_v28 }
 0x24a   : > { %v2437_v62 = vsel %vm2373_vm14, %v2341_v14, %v2405_v8 }
 0x24b   : > { %2470 = vst.msk [vmem:[%s3954_s28 + $0x1c8] sm:$0xff] %vm2440_vm9, %v2437_v62  ;;  %v1879_v59 = vpop.permute.xlu1 %1878  ;;  %v2663_v12 = vpop.permute.xlu2 %2662 }
 0x24c   : > { %v1947_v13 = vadd.f32 %v1879_v59, %v4639_v40  ;;  %3547 = vst.msk [vmem:[%s3954_s28 + $0xd8] sm:$0xff] %vm2276_vm3, %v2663_v12  ;;  %v2071_v2 = vpop.permute.xlu0 %2070 }
 0x24e   : > { %v1979_v3 = vadd.f32 %v1947_v13, %v1751_v6 }
 0x250   : > { %v4728_v9 = vadd.f32 %v2071_v2, %v1979_v3 }
 0x252   : > { %5099 = vst [vmem:[#allocation34_spill] sm:$0xff] %v4728_v9 }
 0x253   : > { %v1593_v25 = vpop.permute.xlu1 %1592  ;;  %v2075_v23 = vpop.permute.xlu2 %2074 }
 0x254   : > { %v1660_v19 = vadd.f32 %v1593_v25, %v4657_v50  ;;  %v1753_v14 = vpop.permute.xlu0 %1752 }
 0x255   : > { %v4732_v47 = vadd.f32 %v1753_v14, %v4657_v50  ;;  %v1980_v8 = vadd.f32 %v1948_v7, %v1753_v14 }
 0x256   : > { %v2340_v28 = vadd.f32 %v3981_v24, %v1660_v19 }
 0x258   : > { %vm2372_vm15 = vcmp.gt.f32.partialorder %v2340_v28, 0.0  ;;  %v2404_v40 = vmul.f32 0.01, %v2340_v28 }
 0x25a   : > { %v2436_v62 = vsel %vm2372_vm15, %v2340_v28, %v2404_v40 }
 0x25b   : > { %2469 = vst.msk [vmem:[%s3954_s28 + $0x1c0] sm:$0xff] %vm2440_vm9, %v2436_v62  ;;  %v2661_v59 = vpop.permute.xlu1 %2660  ;;  %v1757_v6 = vpop.permute.xlu2 %1756 }
 0x25c   : > { %3546 = vst.msk [vmem:[%s3954_s28 + $0xd0] sm:$0xff] %vm2276_vm3, %v2661_v59  ;;  %v4740_v12 = vadd.f32 %v1757_v6, %v4697_v60  ;;  %v1883_v13 = vpop.permute.xlu0 %1882 }
 0x25d   : > { %v1949_v40 = vadd.f32 %v1883_v13, %v4674_v32 }
 0x25e   : > { %5100 = vst [vmem:[#allocation35_spill] sm:$0xff] %v4740_v12 }
 0x263   : > { %v2073_v2 = vpop.permute.xlu1 %2072  ;;  %v1887_v50 = vpop.permute.xlu2 %1886 }
 0x264   : > { %v4742_v7 = vadd.f32 %v2073_v2, %v1980_v8  ;;  %v1951_v3 = vadd.f32 %v1887_v50, %v4712_v29  ;;  %v1597_v25 = vpop.permute.xlu0 %1596 }
 0x265   : > { %v1662_v19 = vadd.f32 %v1597_v25, %v4697_v60 }
 0x267   : > { %v2342_v14 = vadd.f32 %v3981_v24, %v1662_v19 }
 0x269   : > { %vm2374_vm0 = vcmp.gt.f32.partialorder %v2342_v14, 0.0  ;;  %v2406_v28 = vmul.f32 0.01, %v2342_v14 }
 0x26b   : > { %v2438_v62 = vsel %vm2374_vm0, %v2342_v14, %v2406_v28  ;;  %v4748_v59 = vpop.permute.xlu1 %1754  ;;  %v2669_v9 = vpop.permute.xlu2 %2668 }
 0x26c   : > { %2471 = vst.msk [vmem:[%s3954_s28 + $0x1e0] sm:$0xff] %vm2440_vm9, %v2438_v62  ;;  %v1981_v8 = vadd.f32 %v1949_v40, %v4748_v59  ;;  %v2665_v2 = vpop.permute.xlu0 %2664 }
 0x26d   : > { %3550 = vst.msk [vmem:[%s3954_s28 + $0x110] sm:$0xff] %vm2276_vm3, %v2669_v9 }
 0x26e   : > { %v4755_v50 = vadd.f32 %v2075_v23, %v1981_v8  ;;  %3548 = vst.msk [vmem:[%s3954_s28 + $0xf0] sm:$0xff] %vm2276_vm3, %v2665_v2 }
 0x273   : > { %v1885_v25 = vpop.permute.xlu1 %1884 }
 0x274   : > { %v1950_v19 = vadd.f32 %v1885_v25, %v4697_v60  ;;  %v2077_v13 = vpop.permute.xlu0 %2076 }
 0x276   : > { %v1982_v14 = vadd.f32 %v1950_v19, %v1757_v6  ;;  %v1922_v6 = vadd.f32 %v4092_v51, %v3973_v16  ;;  %v1924_v51 = vadd.f32 %v4064_v27, %v4008_v39  ;;  %v1925_v27 = vadd.f32 %v4146_v36, %v4025_v49 }
 0x278   : > { %v4760_v28 = vadd.f32 %v2077_v13, %v1982_v14  ;;  %v1954_v19 = vadd.f32 %v1922_v6, %v4089_v46 }
 0x27b   : > { %v1599_v12 = vpop.permute.xlu1 %1598 }
 0x27c   : > { %v1663_v40 = vadd.f32 %v1599_v12, %v4712_v29  ;;  %v1759_v62 = vpop.permute.xlu0 %1758 }
 0x27d   : > { %v4764_v9 = vadd.f32 %v1759_v62, %v4712_v29  ;;  %v4766_v23 = vadd.f32 %v1951_v3, %v1759_v62  ;;  %v1920_v29 = vadd.f32 %v4040_v61, %v3944_v1  ;;  %v1921_v3 = vadd.f32 %v4005_v38, %v3964_v10 }
 0x27e   : > { %v2343_v8 = vadd.f32 %v3981_v24, %v1663_v40  ;;  %v2114_v1 = vadd.f32 %v4023_v48, %v1954_v19  ;;  %v1956_v61 = vadd.f32 %v1924_v51, %v4129_v20  ;;  %v1812_v38 = vadd.f32 %v4570_v54, %v4419_v43  ;;  %v5104_v51 = vld [vmem:[#allocation2_spill] sm:$0xff] }
 0x27f   : > { %v1953_v24 = vadd.f32 %v1921_v3, %v4072_v30  ;;  %v1952_v16 = vadd.f32 %v1920_v29, %v3998_v34  ;;  %v1923_v48 = vadd.f32 %v4125_v18, %v3988_v26  ;;  %v1957_v26 = vadd.f32 %v1925_v27, %v4164_v56  ;;  %v5103_v29 = vld [vmem:[#allocation12_spill] sm:$0xff] }
 0x280   : > { %vm2375_vm2 = vcmp.gt.f32.partialorder %v2343_v8, 0.0  ;;  %v2407_v2 = vmul.f32 0.01, %v2343_v8  ;;  %v2116_v39 = vadd.f32 %v4140_v31, %v1956_v61  ;;  %v2496_v43 = vadd.f32 %v4011_v41, %v1812_v38  ;;  %v5108_v61 = vld [vmem:[#allocation9_spill] sm:$0xff]  ;;  %v5111_v27 = vld [vmem:[#allocation8_spill] sm:$0xff] }
 0x281   : > { %v2112_v13 = vadd.f32 %v4046_v0, %v1952_v16  ;;  %v2113_v14 = vadd.f32 %v4051_v5, %v1953_v24  ;;  %v2494_v31 = vadd.f32 %v4011_v41, %v4457_v17  ;;  %v1955_v49 = vadd.f32 %v1923_v48, %v4042_v63  ;;  %v5101_v17 = vld [vmem:[#allocation3_spill] sm:$0xff] }
 0x282   : > { %v2439_v60 = vsel %vm2375_vm2, %v2343_v8, %v2407_v2  ;;  %v2560_v36 = vmul.f32 0.01, %v2496_v43  ;;  %vm2528_vm8 = vcmp.gt.f32.partialorder %v2496_v43, 0.0  ;;  %v1928_v56 = vadd.f32 %v5103_v29, %v4096_v52  ;;  %v5107_v52 = vld [vmem:[#allocation4_spill] sm:$0xff] }
 0x283   : > { %2472 = vst.msk [vmem:[%s3954_s28 + $0x1e8] sm:$0xff] %vm2440_vm9, %v2439_v60  ;;  %v2667_v25 = vpop.permute.xlu1 %2666  ;;  %v2558_v2 = vmul.f32 0.01, %v2494_v31  ;;  %v2117_v60 = vadd.f32 %v4110_v4, %v1957_v26  ;;  %vm2526_vm10 = vcmp.gt.f32.partialorder %v2494_v31, 0.0  ;;  %v2115_v6 = vadd.f32 %v5101_v17, %v1955_v49  ;;  %v5112_v26 = vld [vmem:[#allocation11_spill] sm:$0xff] }
 0x284   : > { %3549 = vst.msk [vmem:[%s3954_s28 + $0xf8] sm:$0xff] %vm2276_vm3, %v2667_v25  ;;  %v2671_v12 = vpop.permute.xlu0 %2670  ;;  %v5102_v25 = vld [vmem:[#allocation6_spill] sm:$0xff]  ;;  %v2495_v3 = vadd.f32 %v4011_v41, %v4527_v15  ;;  %v2592_v24 = vsel %vm2528_vm8, %v2496_v43, %v2560_v36  ;;  %v1930_v49 = vadd.f32 %v5112_v26, %v4148_v37  ;;  %v1815_v36 = vadd.f32 %v4651_v44, %v4511_v42 }
 0x285   : > { %3551 = vst.msk [vmem:[%s3954_s28 + $0x118] sm:$0xff] %vm2276_vm3, %v2671_v12  ;;  %v1926_v12 = vadd.f32 %v5102_v25, %v4055_v11  ;;  %v2590_v16 = vsel %vm2526_vm10, %v2494_v31, %v2558_v2  ;;  %v2497_v42 = vadd.f32 %v4011_v41, %v4544_v21  ;;  %v2498_v21 = vadd.f32 %v4011_v41, %v4614_v45 }
 0x286   : > { %vm2527_vm11 = vcmp.gt.f32.partialorder %v2495_v3, 0.0  ;;  %v2499_v37 = vadd.f32 %v4011_v41, %v1815_v36 }
 0x287   : > { %v1958_v15 = vadd.f32 %v1926_v12, %v5107_v52  ;;  %v5114_v12 = vld [vmem:[#allocation14_spill] sm:$0xff]  ;;  %v2562_v52 = vmul.f32 0.01, %v2498_v21 }
 0x288   : > { %v1929_v29 = vadd.f32 %v5114_v12, %v4131_v22  ;;  %v2563_v22 = vmul.f32 0.01, %v2499_v37  ;;  %vm2531_vm2 = vcmp.gt.f32.partialorder %v2499_v37, 0.0  ;;  %v5122_v12 = vld [vmem:[#allocation21_spill] sm:$0xff] }
 0x28c   : > { %v4790_v10 = vpop.permute.xlu0 %2765 }
 0x28d   : > { %v2770_v30 = vadd.f32 %v4790_v10, %v2114_v1  ;;  %v2769_v34 = vadd.f32 %v4790_v10, %v2113_v14  ;;  %v2768_v46 = vadd.f32 %v4790_v10, %v2112_v13  ;;  %v2772_v62 = vadd.f32 %v4790_v10, %v2116_v39  ;;  %v5105_v13 = vld [vmem:[#allocation5_spill] sm:$0xff]  ;;  %v5109_v39 = vld [vmem:[#allocation10_spill] sm:$0xff] }
 0x28e   : > { %v2773_v19 = vadd.f32 %v4790_v10, %v2117_v60  ;;  %v2771_v4 = vadd.f32 %v4790_v10, %v2115_v6  ;;  %v1927_v11 = vadd.f32 %v5105_v13, %v5104_v51  ;;  %v5106_v14 = vld [vmem:[#allocation13_spill] sm:$0xff]  ;;  %v5113_v6 = vld [vmem:[#allocation16_spill] sm:$0xff]  ;;  %v2595_v13 = vsel %vm2531_vm2, %v2499_v37, %v2563_v22 }
 0x28f   : > { %vm2802_vm4 = vcmp.gt.f32.partialorder %v2770_v30, 0.0  ;;  %v2834_v0 = vmul.f32 0.01, %v2770_v30  ;;  %vm2801_vm5 = vcmp.gt.f32.partialorder %v2769_v34, 0.0  ;;  %v2833_v5 = vmul.f32 0.01, %v2769_v34 }
 0x290   : > { %vm2800_vm6 = vcmp.gt.f32.partialorder %v2768_v46, 0.0  ;;  %v2832_v20 = vmul.f32 0.01, %v2768_v46  ;;  %v2836_v18 = vmul.f32 0.01, %v2772_v62  ;;  %vm2804_vm7 = vcmp.gt.f32.partialorder %v2772_v62, 0.0 }
 0x291   : > { %v2866_v54 = vsel %vm2802_vm4, %v2770_v30, %v2834_v0  ;;  %v2865_v40 = vsel %vm2801_vm5, %v2769_v34, %v2833_v5  ;;  %v1960_v1 = vadd.f32 %v1928_v56, %v5106_v14  ;;  %v1959_v38 = vadd.f32 %v1927_v11, %v5108_v61  ;;  %v5110_v5 = vld [vmem:[#allocation7_spill] sm:$0xff]  ;;  %v5116_v11 = vld [vmem:[#allocation17_spill] sm:$0xff] }
 0x292   : > { %2932 = vrot.lane.b32.xlu0 %v2866_v54, %s3726_s13  ;;  %2930 = vrot.lane.b32.xlu2 %v2865_v40, %s3726_s13  ;;  %v2864_v8 = vsel %vm2800_vm6, %v2768_v46, %v2832_v20  ;;  %v2868_v63 = vsel %vm2804_vm7, %v2772_v62, %v2836_v18  ;;  %v2559_v30 = vmul.f32 0.01, %v2495_v3  ;;  %v2837_v34 = vmul.f32 0.01, %v2773_v19 }
 0x293   : > { %2928 = vrot.lane.b32.xlu1 %v2864_v8, %s3726_s13  ;;  %v2835_v46 = vmul.f32 0.01, %v2771_v4  ;;  %vm2805_vm12 = vcmp.gt.f32.partialorder %v2773_v19, 0.0  ;;  %v2119_v0 = vadd.f32 %v5109_v39, %v1959_v38  ;;  %v2120_v48 = vadd.f32 %v5110_v5, %v1960_v1  ;;  %v5119_v5 = vld [vmem:[#allocation18_spill] sm:$0xff] }
 0x294   : > { %vm2803_vm13 = vcmp.gt.f32.partialorder %v2771_v4, 0.0  ;;  %v2118_v20 = vadd.f32 %v5111_v27, %v1958_v15  ;;  %v2591_v43 = vsel %vm2527_vm11, %v2495_v3, %v2559_v30  ;;  %v2869_v54 = vsel %vm2805_vm12, %v2773_v19, %v2837_v34  ;;  %v5117_v30 = vld [vmem:[#allocation19_spill] sm:$0xff] }
 0x295   : > { %v2775_v40 = vadd.f32 %v4790_v10, %v2119_v0  ;;  %v2776_v62 = vadd.f32 %v4790_v10, %v2120_v48  ;;  %v2867_v31 = vsel %vm2803_vm13, %v2771_v4, %v2835_v46  ;;  %v1962_v18 = vadd.f32 %v1930_v49, %v4281_v53  ;;  %v5118_v46 = vld [vmem:[#allocation20_spill] sm:$0xff] }
 0x296   : > { %v2774_v8 = vadd.f32 %v4790_v10, %v2118_v20  ;;  %v2561_v19 = vmul.f32 0.01, %v2497_v42  ;;  %vm2529_vm4 = vcmp.gt.f32.partialorder %v2497_v42, 0.0  ;;  %v2779_v14 = vadd.f32 %v4790_v10, %v5116_v11 }
 0x297   : > { %v2839_v2 = vmul.f32 0.01, %v2775_v40  ;;  %v2840_v60 = vmul.f32 0.01, %v2776_v62  ;;  %vm2807_vm1 = vcmp.gt.f32.partialorder %v2775_v40, 0.0  ;;  %vm2808_vm14 = vcmp.gt.f32.partialorder %v2776_v62, 0.0 }
 0x298   : > { %v2838_v17 = vmul.f32 0.01, %v2774_v8  ;;  %v2122_v25 = vadd.f32 %v5113_v6, %v1962_v18  ;;  %vm2806_vm15 = vcmp.gt.f32.partialorder %v2774_v8, 0.0  ;;  %v2593_v1 = vsel %vm2529_vm4, %v2497_v42, %v2561_v19  ;;  %v5121_v6 = vld [vmem:[#allocation23_spill] sm:$0xff]  ;;  %v5123_v42 = vld [vmem:[#allocation25_spill] sm:$0xff]  ;;  %v5125_v19 = vld [vmem:[#allocation24_spill] sm:$0xff] }
 0x299   : > { %v2871_v56 = vsel %vm2807_vm1, %v2775_v40, %v2839_v2  ;;  %v2872_v3 = vsel %vm2808_vm14, %v2776_v62, %v2840_v60  ;;  %v2843_v15 = vmul.f32 0.01, %v2779_v14  ;;  %vm2530_vm5 = vcmp.gt.f32.partialorder %v2498_v21, 0.0 }
 0x29a   : > { %2936 = vrot.lane.b32.xlu2 %v2868_v63, %s3726_s13  ;;  %2676 = vrot.lane.b32.xlu0 %v2592_v24, %s3726_s13  ;;  %v2778_v53 = vadd.f32 %v4790_v10, %v2122_v25  ;;  %v2870_v44 = vsel %vm2806_vm15, %v2774_v8, %v2838_v17  ;;  %v1961_v63 = vadd.f32 %v1929_v29, %v4202_v58  ;;  %vm2811_vm6 = vcmp.gt.f32.partialorder %v2779_v14, 0.0  ;;  %v5120_v8 = vld [vmem:[#allocation22_spill] sm:$0xff] }
 0x29b   : > { %2672 = vrot.lane.b32.xlu1 %v2590_v16, %s3726_s13  ;;  %v5115_v16 = vld [vmem:[#allocation15_spill] sm:$0xff]  ;;  %v2594_v45 = vsel %vm2530_vm5, %v2498_v21, %v2562_v52  ;;  %v2875_v38 = vsel %vm2811_vm6, %v2779_v14, %v2843_v15  ;;  %v2781_v34 = vadd.f32 %v4790_v10, %v5117_v30  ;;  %v2782_v39 = vadd.f32 %v4790_v10, %v5118_v46 }
 0x29c   : > { %v2842_v24 = vmul.f32 0.01, %v2778_v53  ;;  %vm2810_vm0 = vcmp.gt.f32.partialorder %v2778_v53, 0.0  ;;  %v2121_v4 = vadd.f32 %v5115_v16, %v1961_v63  ;;  %v2780_v48 = vadd.f32 %v4790_v10, %v5119_v5  ;;  %v5124_v63 = vld [vmem:[#allocation26_spill] sm:$0xff]  ;;  %v5127_v15 = vld [vmem:[#allocation31_spill] sm:$0xff] }
 0x29d   : > { %v1818_v27 = vadd.f32 %v4706_v35, %v4596_v57  ;;  %v2845_v20 = vmul.f32 0.01, %v2781_v34  ;;  %vm2813_vm8 = vcmp.gt.f32.partialorder %v2781_v34, 0.0  ;;  %vm2814_vm10 = vcmp.gt.f32.partialorder %v2782_v39, 0.0 }
 0x29e   : > { %v2874_v51 = vsel %vm2810_vm0, %v2778_v53, %v2842_v24  ;;  %v2777_v58 = vadd.f32 %v4790_v10, %v2121_v4  ;;  %vm2812_vm11 = vcmp.gt.f32.partialorder %v2780_v48, 0.0  ;;  %v2784_v26 = vadd.f32 %v4790_v10, %v5120_v8  ;;  %v5131_v8 = vld [vmem:[#allocation33_spill] sm:$0xff] }
 0x29f   : > { %v2502_v40 = vadd.f32 %v4011_v41, %v1818_v27  ;;  %v2877_v62 = vsel %vm2813_vm8, %v2781_v34, %v2845_v20  ;;  %v2500_v49 = vadd.f32 %v4011_v41, %v4631_v33  ;;  %v2501_v2 = vadd.f32 %v4011_v41, %v4684_v55 }
 0x2a0   : > { %v2841_v61 = vmul.f32 0.01, %v2777_v58  ;;  %vm2809_vm7 = vcmp.gt.f32.partialorder %v2777_v58, 0.0  ;;  %v2848_v57 = vmul.f32 0.01, %v2784_v26  ;;  %vm2816_vm12 = vcmp.gt.f32.partialorder %v2784_v26, 0.0 }
 0x2a1   : > { %v2566_v35 = vmul.f32 0.01, %v2502_v40  ;;  %v2564_v36 = vmul.f32 0.01, %v2500_v49  ;;  %vm2534_vm13 = vcmp.gt.f32.partialorder %v2502_v40, 0.0  ;;  %vm2532_vm1 = vcmp.gt.f32.partialorder %v2500_v49, 0.0 }
 0x2a2   : > { %2674 = vrot.lane.b32.xlu2 %v2591_v43, %s3726_s13  ;;  %2938 = vrot.lane.b32.xlu0 %v2869_v54, %s3726_s13  ;;  %v2873_v0 = vsel %vm2809_vm7, %v2777_v58, %v2841_v61  ;;  %v2846_v43 = vmul.f32 0.01, %v2782_v39  ;;  %v2844_v54 = vmul.f32 0.01, %v2780_v48  ;;  %v2880_v60 = vsel %vm2816_vm12, %v2784_v26, %v2848_v57  ;;  %v5126_v58 = vld [vmem:[#allocation28_spill] sm:$0xff] }
 0x2a3   : > { %2934 = vrot.lane.b32.xlu1 %v2867_v31, %s3726_s13  ;;  %v2598_v17 = vsel %vm2534_vm13, %v2502_v40, %v2566_v35  ;;  %v2785_v33 = vadd.f32 %v4790_v10, %v5121_v6  ;;  %v2596_v25 = vsel %vm2532_vm1, %v2500_v49, %v2564_v36  ;;  %v2783_v29 = vadd.f32 %v4790_v10, %v5122_v12  ;;  %v5133_v12 = vld [vmem:[#allocation35_spill] sm:$0xff] }
 0x2a4   : > { %v2878_v31 = vsel %vm2814_vm10, %v2782_v39, %v2846_v43  ;;  %v2876_v18 = vsel %vm2812_vm11, %v2780_v48, %v2844_v54  ;;  %v2565_v37 = vmul.f32 0.01, %v2501_v2  ;;  %vm2533_vm14 = vcmp.gt.f32.partialorder %v2501_v2, 0.0  ;;  %v5128_v39 = vld [vmem:[#allocation29_spill] sm:$0xff]  ;;  %v5129_v48 = vld [vmem:[#allocation27_spill] sm:$0xff] }
 0x2a5   : > { %vm2817_vm15 = vcmp.gt.f32.partialorder %v2785_v33, 0.0  ;;  %vm2815_vm0 = vcmp.gt.f32.partialorder %v2783_v29, 0.0  ;;  %v2788_v24 = vadd.f32 %v4790_v10, %v5124_v63  ;;  %v2786_v16 = vadd.f32 %v4790_v10, %v5125_v19 }
 0x2a6   : > { %v2597_v55 = vsel %vm2533_vm14, %v2501_v2, %v2565_v37  ;;  %v1821_v4 = vadd.f32 %v4748_v59, %v4674_v32  ;;  %v2790_v52 = vadd.f32 %v4790_v10, %v5126_v58  ;;  %v2503_v61 = vadd.f32 %v4011_v41, %v5127_v15 }
 0x2a7   : > { %vm2820_vm4 = vcmp.gt.f32.partialorder %v2788_v24, 0.0  ;;  %vm2818_vm5 = vcmp.gt.f32.partialorder %v2786_v16, 0.0  ;;  %v2504_v30 = vadd.f32 %v4011_v41, %v4732_v47  ;;  %v2789_v27 = vadd.f32 %v4790_v10, %v5129_v48 }
 0x2a8   : > { %v2505_v11 = vadd.f32 %v4011_v41, %v1821_v4  ;;  %v2854_v32 = vmul.f32 0.01, %v2790_v52  ;;  %vm2822_vm6 = vcmp.gt.f32.partialorder %v2790_v52, 0.0  ;;  %vm2535_vm8 = vcmp.gt.f32.partialorder %v2503_v61, 0.0 }
 0x2a9   : > { %v2568_v20 = vmul.f32 0.01, %v2504_v30  ;;  %v2853_v54 = vmul.f32 0.01, %v2789_v27  ;;  %vm2536_vm10 = vcmp.gt.f32.partialorder %v2504_v30, 0.0  ;;  %vm2821_vm12 = vcmp.gt.f32.partialorder %v2789_v27, 0.0 }
 0x2aa   : > { %2942 = vrot.lane.b32.xlu2 %v2871_v56, %s3726_s13  ;;  %2944 = vrot.lane.b32.xlu0 %v2872_v3, %s3726_s13  ;;  %v2849_v56 = vmul.f32 0.01, %v2785_v33  ;;  %v2847_v3 = vmul.f32 0.01, %v2783_v29  ;;  %v2569_v59 = vmul.f32 0.01, %v2505_v11  ;;  %v2886_v34 = vsel %vm2822_vm6, %v2790_v52, %v2854_v32 }
 0x2ab   : > { %2940 = vrot.lane.b32.xlu1 %v2870_v44, %s3726_s13  ;;  %v2787_v44 = vadd.f32 %v4790_v10, %v5123_v42  ;;  %vm2537_vm7 = vcmp.gt.f32.partialorder %v2505_v11, 0.0  ;;  %v2600_v47 = vsel %vm2536_vm10, %v2504_v30, %v2568_v20  ;;  %v2794_v26 = vadd.f32 %v4790_v10, %v5131_v8 }
 0x2ac   : > { %v2881_v53 = vsel %vm2817_vm15, %v2785_v33, %v2849_v56  ;;  %v2879_v22 = vsel %vm2815_vm0, %v2783_v29, %v2847_v3  ;;  %v2601_v46 = vsel %vm2537_vm7, %v2505_v11, %v2569_v59  ;;  %v2885_v49 = vsel %vm2821_vm12, %v2789_v27, %v2853_v54 }
 0x2ad   : > { %v2851_v21 = vmul.f32 0.01, %v2787_v44  ;;  %vm2819_vm2 = vcmp.gt.f32.partialorder %v2787_v44, 0.0  ;;  %v2858_v2 = vmul.f32 0.01, %v2794_v26  ;;  %vm2826_vm1 = vcmp.gt.f32.partialorder %v2794_v26, 0.0 }
 0x2ae   : > { %v2796_v33 = vadd.f32 %v4790_v10, %v4742_v7  ;;  %v2506_v29 = vadd.f32 %v4011_v41, %v5133_v12 }
 0x2af   : > { %v2883_v14 = vsel %vm2819_vm2, %v2787_v44, %v2851_v21  ;;  %v2890_v6 = vsel %vm2826_vm1, %v2794_v26, %v2858_v2  ;;  %v2079_v44 = vpop.permute.xlu1 %2078 }
 0x2b0   : > { %v2860_v3 = vmul.f32 0.01, %v2796_v33  ;;  %vm2828_vm15 = vcmp.gt.f32.partialorder %v2796_v33, 0.0  ;;  %v2570_v7 = vmul.f32 0.01, %v2506_v29  ;;  %vm2538_vm2 = vcmp.gt.f32.partialorder %v2506_v29, 0.0 }
 0x2b2   : > { %2948 = vrot.lane.b32.xlu2 %v2874_v51, %s3726_s13  ;;  %2682 = vrot.lane.b32.xlu0 %v2595_v13, %s3726_s13  ;;  %v2852_v51 = vmul.f32 0.01, %v2788_v24  ;;  %v2850_v13 = vmul.f32 0.01, %v2786_v16  ;;  %v2602_v63 = vsel %vm2538_vm2, %v2506_v29, %v2570_v7 }
 0x2b3   : > { %2678 = vrot.lane.b32.xlu1 %v2593_v1, %s3726_s13 }
 0x2b4   : > { %v2884_v1 = vsel %vm2820_vm4, %v2788_v24, %v2852_v51  ;;  %v5134_v24 = vld [vmem:[#allocation34_spill] sm:$0xff] }
 0x2ba   : > { %2680 = vrot.lane.b32.xlu2 %v2594_v45, %s3726_s13  ;;  %2950 = vrot.lane.b32.xlu0 %v2875_v38, %s3726_s13  ;;  %v2882_v45 = vsel %vm2818_vm5, %v2786_v16, %v2850_v13  ;;  %v2567_v38 = vmul.f32 0.01, %v2503_v61  ;;  %v2143_v16 = vadd.f32 %v2079_v44, %v4766_v23  ;;  %v2798_v13 = vadd.f32 %v4790_v10, %v4760_v28 }
 0x2bb   : > { %2946 = vrot.lane.b32.xlu1 %v2873_v0, %s3726_s13  ;;  %v2791_v0 = vadd.f32 %v4790_v10, %v5128_v39 }
 0x2bc   : > { %v2599_v5 = vsel %vm2535_vm8, %v2503_v61, %v2567_v38  ;;  %v2799_v21 = vadd.f32 %v4790_v10, %v2143_v16  ;;  %v2862_v58 = vmul.f32 0.01, %v2798_v13  ;;  %vm2830_vm7 = vcmp.gt.f32.partialorder %v2798_v13, 0.0 }
 0x2bd   : > { %v2855_v43 = vmul.f32 0.01, %v2791_v0  ;;  %vm2823_vm11 = vcmp.gt.f32.partialorder %v2791_v0, 0.0 }
 0x2be   : > { %vm2831_vm6 = vcmp.gt.f32.partialorder %v2799_v21, 0.0 }
 0x2bf   : > { %v2887_v40 = vsel %vm2823_vm11, %v2791_v0, %v2855_v43 }
 0x2c2   : > { %2954 = vrot.lane.b32.xlu2 %v2877_v62, %s3726_s13  ;;  %2956 = vrot.lane.b32.xlu0 %v2878_v31, %s3726_s13  ;;  %v5130_v62 = vld [vmem:[#allocation32_spill] sm:$0xff] }
 0x2c3   : > { %2952 = vrot.lane.b32.xlu1 %v2876_v18, %s3726_s13  ;;  %v2793_v31 = vadd.f32 %v4790_v10, %v5130_v62  ;;  %v5132_v18 = vld [vmem:[#allocation30_spill] sm:$0xff] }
 0x2c4   : > { %v2792_v57 = vadd.f32 %v4790_v10, %v5132_v18 }
 0x2c5   : > { %v2857_v36 = vmul.f32 0.01, %v2793_v31  ;;  %vm2825_vm13 = vcmp.gt.f32.partialorder %v2793_v31, 0.0 }
 0x2c6   : > { %vm2824_vm14 = vcmp.gt.f32.partialorder %v2792_v57, 0.0 }
 0x2ca   : > { %2960 = vrot.lane.b32.xlu2 %v2880_v60, %s3726_s13  ;;  %2688 = vrot.lane.b32.xlu0 %v2598_v17, %s3726_s13  ;;  %v2856_v60 = vmul.f32 0.01, %v2792_v57  ;;  %v2889_v17 = vsel %vm2825_vm13, %v2793_v31, %v2857_v36 }
 0x2cb   : > { %2684 = vrot.lane.b32.xlu1 %v2596_v25, %s3726_s13  ;;  %v2797_v25 = vadd.f32 %v4790_v10, %v4755_v50  ;;  %v2507_v50 = vadd.f32 %v4011_v41, %v4764_v9 }
 0x2cc   : > { %v2888_v37 = vsel %vm2824_vm14, %v2792_v57, %v2856_v60 }
 0x2cd   : > { %vm2829_vm0 = vcmp.gt.f32.partialorder %v2797_v25, 0.0  ;;  %v2571_v41 = vmul.f32 0.01, %v2507_v50  ;;  %vm2539_vm4 = vcmp.gt.f32.partialorder %v2507_v50, 0.0 }
 0x2cf   : > { %v2603_v4 = vsel %vm2539_vm4, %v2507_v50, %v2571_v41 }
 0x2d2   : > { %2686 = vrot.lane.b32.xlu2 %v2597_v55, %s3726_s13  ;;  %2962 = vrot.lane.b32.xlu0 %v2881_v53, %s3726_s13  ;;  %v2861_v55 = vmul.f32 0.01, %v2797_v25  ;;  %v2892_v53 = vsel %vm2828_vm15, %v2796_v33, %v2860_v3 }
 0x2d3   : > { %2958 = vrot.lane.b32.xlu1 %v2879_v22, %s3726_s13  ;;  %v2795_v22 = vadd.f32 %v4790_v10, %v5134_v24  ;;  %v2894_v10 = vsel %vm2830_vm7, %v2798_v13, %v2862_v58 }
 0x2d4   : > { %v2893_v42 = vsel %vm2829_vm0, %v2797_v25, %v2861_v55 }
 0x2d5   : > { %v2859_v9 = vmul.f32 0.01, %v2795_v22  ;;  %vm2827_vm5 = vcmp.gt.f32.partialorder %v2795_v22, 0.0 }
 0x2d7   : > { %v2891_v51 = vsel %vm2827_vm5, %v2795_v22, %v2859_v9 }
 0x2da   : > { %2966 = vrot.lane.b32.xlu2 %v2883_v14, %s3726_s13  ;;  %2968 = vrot.lane.b32.xlu0 %v2884_v1, %s3726_s13  ;;  %v2863_v1 = vmul.f32 0.01, %v2799_v21 }
 0x2db   : > { %2964 = vrot.lane.b32.xlu1 %v2882_v45, %s3726_s13 }
 0x2dc   : > { %v2895_v28 = vsel %vm2831_vm6, %v2799_v21, %v2863_v1 }
 0x2e2   : > { %2972 = vrot.lane.b32.xlu2 %v2886_v34, %s3726_s13  ;;  %2694 = vrot.lane.b32.xlu0 %v2601_v46, %s3726_s13 }
 0x2e3   : > { %2690 = vrot.lane.b32.xlu1 %v2599_v5, %s3726_s13 }
 0x2ea   : > { %2692 = vrot.lane.b32.xlu2 %v2600_v47, %s3726_s13  ;;  %2974 = vrot.lane.b32.xlu0 %v2887_v40, %s3726_s13 }
 0x2eb   : > { %2970 = vrot.lane.b32.xlu1 %v2885_v49, %s3726_s13 }
 0x2ec   : > { %v2931_v35 = vpop.permute.xlu2 %2930 }
 0x2ed   : > { %3567 = vst.msk [vmem:[%s3954_s28 + $0x18] sm:$0xff] %vm2440_vm9, %v2931_v35 }
 0x2f2   : > { %2978 = vrot.lane.b32.xlu2 %v2889_v17, %s3726_s13  ;;  %2980 = vrot.lane.b32.xlu0 %v2890_v6, %s3726_s13 }
 0x2f3   : > { %2976 = vrot.lane.b32.xlu1 %v2888_v37, %s3726_s13 }
 0x2f4   : > { %v2937_v56 = vpop.permute.xlu2 %2936 }
 0x2f5   : > { %3570 = vst.msk [vmem:[%s3954_s28 + $0x50] sm:$0xff] %vm2440_vm9, %v2937_v56 }
 0x2fa   : > { %2984 = vrot.lane.b32.xlu2 %v2892_v53, %s3726_s13  ;;  %2986 = vrot.lane.b32.xlu0 %v2893_v42, %s3726_s13 }
 0x2fb   : > { %2696 = vrot.lane.b32.xlu1 %v2602_v63, %s3726_s13 }
 0x2fc   : > { %v2675_v19 = vpop.permute.xlu2 %2674 }
 0x2fd   : > { %3553 = vst.msk [vmem:[%s3954_s28 + $0x138] sm:$0xff] %vm2276_vm3, %v2675_v19 }
 0x302   : > { %2698 = vrot.lane.b32.xlu2 %v2603_v4, %s3726_s13 }
 0x303   : > { %2982 = vrot.lane.b32.xlu1 %v2891_v51, %s3726_s13 }
 0x304   : > { %v2933_v23 = vpop.permute.xlu0 %2932  ;;  %v2943_v11 = vpop.permute.xlu2 %2942 }
 0x305   : > { %3568 = vst.msk [vmem:[%s3954_s28 + $0x30] sm:$0xff] %vm2440_vm9, %v2933_v23  ;;  %v2929_v14 = vpop.permute.xlu1 %2928 }
 0x306   : > { %3566 = vst.msk [vmem:[%s3954_s28 + $0x10] sm:$0xff] %vm2440_vm9, %v2929_v14 }
 0x307   : > { %3573 = vst.msk [vmem:[%s3954_s28 + $0x78] sm:$0xff] %vm2440_vm9, %v2943_v11 }
 0x30a   : > { %2990 = vrot.lane.b32.xlu2 %v2895_v28, %s3726_s13 }
 0x30b   : > { %2988 = vrot.lane.b32.xlu1 %v2894_v10, %s3726_s13 }
 0x30c   : > { %v2949_v52 = vpop.permute.xlu2 %2948  ;;  %v2677_v15 = vpop.permute.xlu0 %2676 }
 0x30d   : > { %v2673_v61 = vpop.permute.xlu1 %2672  ;;  %3576 = vst.msk [vmem:[%s3954_s28 + $0xb0] sm:$0xff] %vm2440_vm9, %v2949_v52 }
 0x30e   : > { %3552 = vst.msk [vmem:[%s3954_s28 + $0x130] sm:$0xff] %vm2276_vm3, %v2673_v61 }
 0x30f   : > { %3554 = vst.msk [vmem:[%s3954_s28 + $0x150] sm:$0xff] %vm2276_vm3, %v2677_v15 }
 0x314   : > { %v2939_v45 = vpop.permute.xlu0 %2938  ;;  %v2681_v32 = vpop.permute.xlu2 %2680 }
 0x315   : > { %v2935_v59 = vpop.permute.xlu1 %2934  ;;  %3571 = vst.msk [vmem:[%s3954_s28 + $0x58] sm:$0xff] %vm2440_vm9, %v2939_v45 }
 0x316   : > { %3569 = vst.msk [vmem:[%s3954_s28 + $0x38] sm:$0xff] %vm2440_vm9, %v2935_v59 }
 0x317   : > { %3556 = vst.msk [vmem:[%s3954_s28 + $0x170] sm:$0xff] %vm2276_vm3, %v2681_v32 }
 0x31c   : > { %v2945_v38 = vpop.permute.xlu0 %2944  ;;  %v2955_v30 = vpop.permute.xlu2 %2954 }
 0x31d   : > { %v2941_v34 = vpop.permute.xlu1 %2940  ;;  %3574 = vst.msk [vmem:[%s3954_s28 + $0x90] sm:$0xff] %vm2440_vm9, %v2945_v38 }
 0x31e   : > { %3572 = vst.msk [vmem:[%s3954_s28 + $0x70] sm:$0xff] %vm2440_vm9, %v2941_v34 }
 0x31f   : > { %3579 = vst.msk [vmem:[%s3954_s28 + $0xd8] sm:$0xff] %vm2440_vm9, %v2955_v30 }
 0x324   : > { %v2961_v46 = vpop.permute.xlu2 %2960  ;;  %v2683_v39 = vpop.permute.xlu0 %2682 }
 0x325   : > { %v2679_v0 = vpop.permute.xlu1 %2678  ;;  %3582 = vst.msk [vmem:[%s3954_s28 + $0x110] sm:$0xff] %vm2440_vm9, %v2961_v46 }
 0x326   : > { %3555 = vst.msk [vmem:[%s3954_s28 + $0x158] sm:$0xff] %vm2276_vm3, %v2679_v0 }
 0x327   : > { %3557 = vst.msk [vmem:[%s3954_s28 + $0x178] sm:$0xff] %vm2276_vm3, %v2683_v39 }
 0x32c   : > { %v2951_v5 = vpop.permute.xlu0 %2950  ;;  %v2687_v48 = vpop.permute.xlu2 %2686 }
 0x32d   : > { %v2947_v27 = vpop.permute.xlu1 %2946  ;;  %3577 = vst.msk [vmem:[%s3954_s28 + $0xb8] sm:$0xff] %vm2440_vm9, %v2951_v5 }
 0x32e   : > { %3575 = vst.msk [vmem:[%s3954_s28 + $0x98] sm:$0xff] %vm2440_vm9, %v2947_v27 }
 0x32f   : > { %3559 = vst.msk [vmem:[%s3954_s28 + $0x198] sm:$0xff] %vm2276_vm3, %v2687_v48 }
 0x334   : > { %v2957_v20 = vpop.permute.xlu0 %2956  ;;  %v2967_v43 = vpop.permute.xlu2 %2966 }
 0x335   : > { %v2953_v54 = vpop.permute.xlu1 %2952  ;;  %3580 = vst.msk [vmem:[%s3954_s28 + $0xf0] sm:$0xff] %vm2440_vm9, %v2957_v20 }
 0x336   : > { %3578 = vst.msk [vmem:[%s3954_s28 + $0xd0] sm:$0xff] %vm2440_vm9, %v2953_v54 }
 0x337   : > { %3585 = vst.msk [vmem:[%s3954_s28 + $0x138] sm:$0xff] %vm2440_vm9, %v2967_v43 }
 0x33c   : > { %v2973_v47 = vpop.permute.xlu2 %2972  ;;  %v2689_v40 = vpop.permute.xlu0 %2688 }
 0x33d   : > { %v2685_v62 = vpop.permute.xlu1 %2684  ;;  %3588 = vst.msk [vmem:[%s3954_s28 + $0x170] sm:$0xff] %vm2440_vm9, %v2973_v47 }
 0x33e   : > { %3558 = vst.msk [vmem:[%s3954_s28 + $0x190] sm:$0xff] %vm2276_vm3, %v2685_v62 }
 0x33f   : > { %3560 = vst.msk [vmem:[%s3954_s28 + $0x1b0] sm:$0xff] %vm2276_vm3, %v2689_v40 }
 0x344   : > { %v2963_v31 = vpop.permute.xlu0 %2962  ;;  %v2693_v8 = vpop.permute.xlu2 %2692 }
 0x345   : > { %v2959_v26 = vpop.permute.xlu1 %2958  ;;  %3583 = vst.msk [vmem:[%s3954_s28 + $0x118] sm:$0xff] %vm2440_vm9, %v2963_v31 }
 0x346   : > { %3581 = vst.msk [vmem:[%s3954_s28 + $0xf8] sm:$0xff] %vm2440_vm9, %v2959_v26 }
 0x347   : > { %3562 = vst.msk [vmem:[%s3954_s28 + $0x1d0] sm:$0xff] %vm2276_vm3, %v2693_v8 }
 0x34c   : > { %v2969_v49 = vpop.permute.xlu0 %2968  ;;  %v2979_v18 = vpop.permute.xlu2 %2978 }
 0x34d   : > { %v2965_v57 = vpop.permute.xlu1 %2964  ;;  %3586 = vst.msk [vmem:[%s3954_s28 + $0x150] sm:$0xff] %vm2440_vm9, %v2969_v49 }
 0x34e   : > { %3584 = vst.msk [vmem:[%s3954_s28 + $0x130] sm:$0xff] %vm2440_vm9, %v2965_v57 }
 0x34f   : > { %3591 = vst.msk [vmem:[%s3954_s28 + $0x198] sm:$0xff] %vm2440_vm9, %v2979_v18 }
 0x354   : > { %v2985_v35 = vpop.permute.xlu2 %2984  ;;  %v2695_v36 = vpop.permute.xlu0 %2694 }
 0x355   : > { %v2691_v2 = vpop.permute.xlu1 %2690  ;;  %3594 = vst.msk [vmem:[%s3954_s28 + $0x1d0] sm:$0xff] %vm2440_vm9, %v2985_v35 }
 0x356   : > { %3561 = vst.msk [vmem:[%s3954_s28 + $0x1b8] sm:$0xff] %vm2276_vm3, %v2691_v2 }
 0x357   : > { %3563 = vst.msk [vmem:[%s3954_s28 + $0x1d8] sm:$0xff] %vm2276_vm3, %v2695_v36 }
 0x35c   : > { %v2975_v60 = vpop.permute.xlu0 %2974  ;;  %v2699_v17 = vpop.permute.xlu2 %2698 }
 0x35d   : > { %v2971_v6 = vpop.permute.xlu1 %2970  ;;  %3589 = vst.msk [vmem:[%s3954_s28 + $0x178] sm:$0xff] %vm2440_vm9, %v2975_v60 }
 0x35e   : > { %3587 = vst.msk [vmem:[%s3954_s28 + $0x158] sm:$0xff] %vm2440_vm9, %v2971_v6 }
 0x35f   : > { %3565 = vst.msk [vmem:[%s3954_s28 + $0x1f8] sm:$0xff] %vm2276_vm3, %v2699_v17 }
 0x364   : > { %v2981_v33 = vpop.permute.xlu0 %2980  ;;  %v2991_v25 = vpop.permute.xlu2 %2990 }
 0x365   : > { %v2977_v12 = vpop.permute.xlu1 %2976  ;;  %3592 = vst.msk [vmem:[%s3954_s28 + $0x1b0] sm:$0xff] %vm2440_vm9, %v2981_v33 }
 0x366   : > { %3590 = vst.msk [vmem:[%s3954_s28 + $0x190] sm:$0xff] %vm2440_vm9, %v2977_v12 }
 0x367   : > { %3597 = vst.msk [vmem:[%s3954_s28 + $0x1f8] sm:$0xff] %vm2440_vm9, %v2991_v25 }
 0x36c   : > { %v2987_v29 = vpop.permute.xlu0 %2986 }
 0x36d   : > { %3595 = vst.msk [vmem:[%s3954_s28 + $0x1d8] sm:$0xff] %vm2440_vm9, %v2987_v29  ;;  %v2697_v37 = vpop.permute.xlu1 %2696 }
 0x36e   : > { %3564 = vst.msk [vmem:[%s3954_s28 + $0x1f0] sm:$0xff] %vm2276_vm3, %v2697_v37 }
 0x375   : > { %v2983_v56 = vpop.permute.xlu1 %2982 }
 0x376   : > { %3593 = vst.msk [vmem:[%s3954_s28 + $0x1b8] sm:$0xff] %vm2440_vm9, %v2983_v56 }
 0x37d   : > { %v2989_v3 = vpop.permute.xlu1 %2988 }
 0x37e   : > { %3596 = vst.msk [vmem:[%s3954_s28 + $0x1f0] sm:$0xff] %vm2440_vm9, %v2989_v3 }
 0x37f PF: > { %s19_s11 = sadd.s32 1, %s3721_s11   ;;  %s5135_s30 = smov %s3717_s10 }
 0x380   : > { %p16_p6 = scmp.ge.s32.totalorder %s19_s11, 4   ;;  %s5136_s10 = smov %s5138_s12 }
 0x382   :  { %18 = sbr.rel (!%p16_p6) target bundleno = 2 (0x2), region = 96 }

</bundles_post_ra>
